<compile_context>
chip_gen: v6e
topology: v6e:2x2x1
jax: 0.10.0
libtpu: 0.0.40
codegen_flags: <defaults>
</compile_context>

<pallas_src>
import numpy as np

import jax
import jax.numpy as jnp
from jax import lax
from jax.experimental import pallas as pl
from jax.experimental.pallas import tpu as pltpu


def _round_up(v, m):
    return -(-v // m) * m


def block_forward(x, w_t, gamma, beta, eps=1e-5):
    """x: (N, C_in, H, W);  w_t: ConvTranspose2d weight (C_in, C_out, 4, 4)."""
    N, C_in, H, W = x.shape
    C_out = w_t.shape[1]
    Wp2 = W + 2
    P_img = (H + 2) * Wp2                 # padded pixel grid per image
    P_pad = _round_up(P_img, 128)         # lane-dense pixel axis
    HALO = 2 * Wp2 + 2                    # max flat tap offset
    P_halo = _round_up(P_pad + HALO, 128)
    M_real = N * 4 * H * W                # real output pixels (= N*2H*2W)

    # ---- parity decomposition of the transposed conv -----------------------
    # out[n,co,2u+py,2v+px] = sum_{r,c,ci} xp[n,ci,u+py+r,v+px+c]
    #                                      * w_t[ci,co,KTAP[py][r],KTAP[px][c]]
    # with xp = x zero-padded by 1 on each spatial side.  In flat (padded)
    # pixel coordinates q = u*(W+2)+v each tap is a pure flat shift
    # off = (py+r)*(W+2)+(px+c); real output pixels never read past P_img.
    KTAP = ((3, 1), (2, 0))
    OFFS = []                              # OFFS[p][t], p = 2*py+px, t = 2*r+c
    w_rows = []
    for py in range(2):
        for px in range(2):
            offs_p = []
            for r in range(2):
                for c in range(2):
                    offs_p.append((py + r) * Wp2 + (px + c))
                    w_rows.append(jnp.transpose(
                        w_t[:, :, KTAP[py][r], KTAP[px][c]]))   # (C_out, C_in)
            OFFS.append(tuple(offs_p))
    wmat = jnp.stack(w_rows, axis=0).astype(jnp.bfloat16)       # (16, C_out, C_in)

    # padded + flattened input with a zero halo (~1x input bytes; no im2col)
    xp = jnp.pad(x.astype(jnp.bfloat16), ((0, 0), (0, 0), (1, 1), (1, 1)))
    xhalo = jnp.pad(xp.reshape(N, C_in, P_img),
                    ((0, 0), (0, 0), (0, P_halo - P_img)))      # (N, C_in, P_halo)

    # validity mask over the padded pixel grid (1.0 for real output pixels)
    q = np.arange(P_pad)
    mask_np = ((q < P_img) & (q // Wp2 < H) & (q % Wp2 < W)).astype(np.float32)
    mask = jnp.asarray(mask_np).reshape(1, P_pad)

    # ---- kernel 1: per-image conv (all 4 parities) + partial BN stats ------
    def conv_stats_kernel(x_ref, w_ref, mask_ref, y_ref, sum_ref, sq_ref):
        # x_ref: (C_in, P_halo) bf16   w_ref: (16, C_out, C_in) bf16
        # mask_ref: (1, P_pad) f32     y_ref: (4, C_out, P_pad) bf16
        # sum_ref / sq_ref: (C_out, 1) f32 (per-image partials)
        msk = mask_ref[...]
        s_tot = jnp.zeros((C_out, 1), jnp.float32)
        q_tot = jnp.zeros((C_out, 1), jnp.float32)
        for p in range(4):                         # parity, static unroll
            acc = jnp.zeros((C_out, P_pad), jnp.float32)
            for t in range(4):                     # 2x2 taps, static unroll
                off = OFFS[p][t]
                rhs = x_ref[:, off:off + P_pad]    # (C_in, P_pad) bf16
                acc = acc + jnp.dot(w_ref[4 * p + t], rhs,
                                    preferred_element_type=jnp.float32)
            y_ref[p] = acc.astype(y_ref.dtype)
            am = acc * msk                          # mask out padded columns
            s_tot = s_tot + jnp.sum(am, axis=1, keepdims=True)
            q_tot = q_tot + jnp.sum(acc * am, axis=1, keepdims=True)
        sum_ref[...] = s_tot
        sq_ref[...] = q_tot

    y, ysum, ysq = pl.pallas_call(
        conv_stats_kernel,
        out_shape=(
            jax.ShapeDtypeStruct((N, 4, C_out, P_pad), jnp.bfloat16),
            jax.ShapeDtypeStruct((N, C_out, 1), jnp.float32),
            jax.ShapeDtypeStruct((N, C_out, 1), jnp.float32),
        ),
        grid_spec=pltpu.PrefetchScalarGridSpec(
            num_scalar_prefetch=0,
            grid=(N,),
            in_specs=[
                pl.BlockSpec((None, C_in, P_halo), lambda n: (n, 0, 0)),
                pl.BlockSpec((16, C_out, C_in), lambda n: (0, 0, 0)),
                pl.BlockSpec((1, P_pad), lambda n: (0, 0)),
            ],
            out_specs=[
                pl.BlockSpec((None, 4, C_out, P_pad), lambda n: (n, 0, 0, 0)),
                pl.BlockSpec((None, C_out, 1), lambda n: (n, 0, 0)),
                pl.BlockSpec((None, C_out, 1), lambda n: (n, 0, 0)),
            ],
        ),
        # per-image partial stats -> no cross-step accumulator, safe to shard.
        # default scoped-VMEM limit is ample (per-step footprint << 16 MiB).
        compiler_params=pltpu.CompilerParams(
            dimension_semantics=("parallel",),
        ),
    )(xhalo, wmat, mask)

    # ---- glue: finalize training-mode BN statistics (biased variance) ------
    cnt = jnp.float32(M_real)
    mean = jnp.sum(ysum, axis=0) / cnt                       # (C_out, 1)
    var = jnp.maximum(jnp.sum(ysq, axis=0) / cnt - mean * mean, 0.0)
    inv_std = lax.rsqrt(var + eps)
    scale = (gamma.reshape(C_out, 1) * inv_std).astype(jnp.float32)
    shift = (beta.reshape(C_out, 1) - mean * scale).astype(jnp.float32)

    # ---- kernel 2: fused BN affine + LeakyReLU(0.2), channels on sublanes --
    def bn_lrelu_kernel(y_ref, scale_ref, shift_ref, o_ref):
        z = y_ref[...].astype(jnp.float32) * scale_ref[...] + shift_ref[...]
        o_ref[...] = jnp.where(z >= 0, z, 0.2 * z)

    N4 = 4 * N
    out2 = pl.pallas_call(
        bn_lrelu_kernel,
        out_shape=jax.ShapeDtypeStruct((N4, C_out, P_pad), jnp.float32),
        grid_spec=pltpu.PrefetchScalarGridSpec(
            num_scalar_prefetch=0,
            grid=(N4,),
            in_specs=[
                pl.BlockSpec((None, C_out, P_pad), lambda i: (i, 0, 0)),
                pl.BlockSpec((C_out, 1), lambda i: (0, 0)),
                pl.BlockSpec((C_out, 1), lambda i: (0, 0)),
            ],
            out_specs=pl.BlockSpec((None, C_out, P_pad), lambda i: (i, 0, 0)),
        ),
        compiler_params=pltpu.CompilerParams(dimension_semantics=("parallel",)),
    )(y.reshape(N4, C_out, P_pad), scale, shift)

    # ---- back to NCHW: drop padded pixel columns, de-interleave parities ---
    out_p = out2.reshape(N, 2, 2, C_out, P_pad)[..., :P_img]
    out_p = out_p.reshape(N, 2, 2, C_out, H + 2, W + 2)[:, :, :, :, :H, :W]
    return out_p.transpose(0, 3, 4, 1, 5, 2).reshape(N, C_out, 2 * H, 2 * W)


def reference(x, w_t, gamma, beta, eps=1e-5):
    """Pure-JAX f32 reference: conv_transpose + train-mode BN + LeakyReLU."""
    w_conv = jnp.flip(w_t, axis=(2, 3)).transpose(1, 0, 2, 3)   # (C_out, C_in, 4, 4)
    y = lax.conv_general_dilated(
        x, w_conv, window_strides=(1, 1), padding=((2, 2), (2, 2)),
        lhs_dilation=(2, 2), dimension_numbers=("NCHW", "OIHW", "NCHW"))
    mean = y.mean(axis=(0, 2, 3), keepdims=True)
    var = ((y - mean) ** 2).mean(axis=(0, 2, 3), keepdims=True)
    z = (y - mean) / jnp.sqrt(var + eps)
    z = z * gamma[None, :, None, None] + beta[None, :, None, None]
    return jnp.where(z >= 0, z, 0.2 * z)


if __name__ == "__main__":
    N, C_in, C_out, H, W = 2, 4, 8, 16, 16

    key = jax.random.PRNGKey(0)
    kx, kw = jax.random.split(key)
    x = jax.random.normal(kx, (N, C_in, H, W), dtype=jnp.float32)
    # ConvTranspose2d weight shape: (in_ch, out_ch, kH, kW)
    w_t = 0.05 * jax.random.normal(kw, (C_in, C_out, 4, 4), dtype=jnp.float32)
    # BatchNorm2d default affine init: weight=1, bias=0
    gamma = jnp.ones((C_out,), dtype=jnp.float32)
    beta = jnp.zeros((C_out,), dtype=jnp.float32)

    fwd = jax.jit(block_forward)
    out = jax.block_until_ready(fwd(x, w_t, gamma, beta))
    ref = jax.block_until_ready(reference(x, w_t, gamma, beta))

    assert out.shape == (N, C_out, 2 * H, 2 * W), out.shape
    max_err = float(jnp.abs(out - ref).max())
    # bf16 MXU operands + bf16 intermediate y -> loosened tolerance vs f32 ref
    assert jnp.allclose(out, ref, atol=5e-2, rtol=5e-2), max_err
    print("KERNEL_OK")
</pallas_src>

<mosaic_0001>
module attributes {stable_mosaic.version = 11 : i64} {
  func.func @conv_stats_kernel(%arg0: i32, %arg1: memref<1x4x512xbf16, #tpu.memory_space<vmem>>, %arg2: memref<16x8x4xbf16, #tpu.memory_space<vmem>>, %arg3: memref<1x384xf32, #tpu.memory_space<vmem>>, %arg4: memref<1x4x8x384xbf16, #tpu.memory_space<vmem>>, %arg5: memref<1x8x1xf32, #tpu.memory_space<vmem>>, %arg6: memref<1x8x1xf32, #tpu.memory_space<vmem>>) attributes {dimension_semantics = [#tpu.dimension_semantics<parallel>], iteration_bounds = array<i64: 2>, scalar_prefetch = 0 : i64, scratch_operands = 0 : i64, tpu.core_type = #tpu.core_type<tc>, window_params = [{transform_indices = @transform_0, window_bounds = array<i64: 1, 4, 512>}, {pipeline_mode = #tpu.pipeline_mode<synchronous>, transform_indices = @transform_1, window_bounds = array<i64: 16, 8, 4>}, {pipeline_mode = #tpu.pipeline_mode<synchronous>, transform_indices = @transform_2, window_bounds = array<i64: 1, 384>}, {transform_indices = @transform_3, window_bounds = array<i64: 1, 4, 8, 384>}, {transform_indices = @transform_4, window_bounds = array<i64: 1, 8, 1>}, {transform_indices = @transform_5, window_bounds = array<i64: 1, 8, 1>}]} {
    %c0 = arith.constant 0 : index
    %c0_0 = arith.constant 0 : index
    %0 = vector.load %arg3[%c0, %c0_0] : memref<1x384xf32, #tpu.memory_space<vmem>>, vector<1x384xf32>
    %cst = arith.constant 0.000000e+00 : f32
    %1 = vector.broadcast %cst : f32 to vector<8x1xf32>
    %cst_1 = arith.constant 0.000000e+00 : f32
    %2 = vector.broadcast %cst_1 : f32 to vector<8x1xf32>
    %cst_2 = arith.constant 0.000000e+00 : f32
    %3 = vector.broadcast %cst_2 : f32 to vector<8x384xf32>
    %c0_3 = arith.constant 0 : index
    %c0_4 = arith.constant 0 : index
    %c0_5 = arith.constant 0 : index
    %4 = vector.load %arg1[%c0_3, %c0_4, %c0_5] : memref<1x4x512xbf16, #tpu.memory_space<vmem>>, vector<1x4x384xbf16>
    %5 = vector.shape_cast %4 : vector<1x4x384xbf16> to vector<4x384xbf16>
    %c0_6 = arith.constant 0 : index
    %c0_7 = arith.constant 0 : index
    %c0_8 = arith.constant 0 : index
    %6 = vector.load %arg2[%c0_6, %c0_7, %c0_8] : memref<16x8x4xbf16, #tpu.memory_space<vmem>>, vector<1x8x4xbf16>
    %7 = vector.shape_cast %6 : vector<1x8x4xbf16> to vector<8x4xbf16>
    %cst_9 = arith.constant dense<0.000000e+00> : vector<8x384xf32>
    %8 = tpu.matmul %7, %5, %cst_9 {dimension_numbers = #tpu.dot_dimension_numbers<[1], [0], [0], [1], [0, 0, 1, 1], [], []>} : vector<8x4xbf16>, vector<4x384xbf16>, vector<8x384xf32> -> vector<8x384xf32>
    %9 = arith.addf %3, %8 : vector<8x384xf32>
    %c0_10 = arith.constant 0 : index
    %c0_11 = arith.constant 0 : index
    %c1 = arith.constant 1 : index
    %10 = vector.load %arg1[%c0_10, %c0_11, %c1] : memref<1x4x512xbf16, #tpu.memory_space<vmem>>, vector<1x4x384xbf16>
    %11 = vector.shape_cast %10 : vector<1x4x384xbf16> to vector<4x384xbf16>
    %c1_12 = arith.constant 1 : index
    %c0_13 = arith.constant 0 : index
    %c0_14 = arith.constant 0 : index
    %12 = vector.load %arg2[%c1_12, %c0_13, %c0_14] : memref<16x8x4xbf16, #tpu.memory_space<vmem>>, vector<1x8x4xbf16>
    %13 = vector.shape_cast %12 : vector<1x8x4xbf16> to vector<8x4xbf16>
    %cst_15 = arith.constant dense<0.000000e+00> : vector<8x384xf32>
    %14 = tpu.matmul %13, %11, %cst_15 {dimension_numbers = #tpu.dot_dimension_numbers<[1], [0], [0], [1], [0, 0, 1, 1], [], []>} : vector<8x4xbf16>, vector<4x384xbf16>, vector<8x384xf32> -> vector<8x384xf32>
    %15 = arith.addf %9, %14 : vector<8x384xf32>
    %c0_16 = arith.constant 0 : index
    %c0_17 = arith.constant 0 : index
    %c18 = arith.constant 18 : index
    %16 = vector.load %arg1[%c0_16, %c0_17, %c18] : memref<1x4x512xbf16, #tpu.memory_space<vmem>>, vector<1x4x384xbf16>
    %17 = vector.shape_cast %16 : vector<1x4x384xbf16> to vector<4x384xbf16>
    %c2 = arith.constant 2 : index
    %c0_18 = arith.constant 0 : index
    %c0_19 = arith.constant 0 : index
    %18 = vector.load %arg2[%c2, %c0_18, %c0_19] : memref<16x8x4xbf16, #tpu.memory_space<vmem>>, vector<1x8x4xbf16>
    %19 = vector.shape_cast %18 : vector<1x8x4xbf16> to vector<8x4xbf16>
    %cst_20 = arith.constant dense<0.000000e+00> : vector<8x384xf32>
    %20 = tpu.matmul %19, %17, %cst_20 {dimension_numbers = #tpu.dot_dimension_numbers<[1], [0], [0], [1], [0, 0, 1, 1], [], []>} : vector<8x4xbf16>, vector<4x384xbf16>, vector<8x384xf32> -> vector<8x384xf32>
    %21 = arith.addf %15, %20 : vector<8x384xf32>
    %c0_21 = arith.constant 0 : index
    %c0_22 = arith.constant 0 : index
    %c19 = arith.constant 19 : index
    %22 = vector.load %arg1[%c0_21, %c0_22, %c19] : memref<1x4x512xbf16, #tpu.memory_space<vmem>>, vector<1x4x384xbf16>
    %23 = vector.shape_cast %22 : vector<1x4x384xbf16> to vector<4x384xbf16>
    %c3 = arith.constant 3 : index
    %c0_23 = arith.constant 0 : index
    %c0_24 = arith.constant 0 : index
    %24 = vector.load %arg2[%c3, %c0_23, %c0_24] : memref<16x8x4xbf16, #tpu.memory_space<vmem>>, vector<1x8x4xbf16>
    %25 = vector.shape_cast %24 : vector<1x8x4xbf16> to vector<8x4xbf16>
    %cst_25 = arith.constant dense<0.000000e+00> : vector<8x384xf32>
    %26 = tpu.matmul %25, %23, %cst_25 {dimension_numbers = #tpu.dot_dimension_numbers<[1], [0], [0], [1], [0, 0, 1, 1], [], []>} : vector<8x4xbf16>, vector<4x384xbf16>, vector<8x384xf32> -> vector<8x384xf32>
    %27 = arith.addf %21, %26 : vector<8x384xf32>
    %28 = arith.truncf %27 : vector<8x384xf32> to vector<8x384xbf16>
    %c0_26 = arith.constant 0 : index
    %c0_27 = arith.constant 0 : index
    %c0_28 = arith.constant 0 : index
    %c0_29 = arith.constant 0 : index
    %29 = vector.load %arg4[%c0_26, %c0_27, %c0_28, %c0_29] : memref<1x4x8x384xbf16, #tpu.memory_space<vmem>>, vector<1x1x8x384xbf16>
    %30 = vector.shape_cast %29 : vector<1x1x8x384xbf16> to vector<8x384xbf16>
    %31 = vector.shape_cast %28 : vector<8x384xbf16> to vector<1x1x8x384xbf16>
    tpu.vector_store %arg4[%c0_26, %c0_27, %c0_28, %c0_29], %31 {strides = array<i32>} : memref<1x4x8x384xbf16, #tpu.memory_space<vmem>>, vector<1x1x8x384xbf16>,
    %32 = vector.broadcast %0 : vector<1x384xf32> to vector<8x384xf32>
    %33 = arith.mulf %27, %32 : vector<8x384xf32>
    %cst_30 = arith.constant dense<0.000000e+00> : vector<8xf32>
    %34 = vector.multi_reduction <add>, %33, %cst_30 [1] : vector<8x384xf32> to vector<8xf32>
    %35 = vector.shape_cast %34 : vector<8xf32> to vector<8x1xf32>
    %36 = arith.addf %1, %35 : vector<8x1xf32>
    %37 = arith.mulf %27, %33 : vector<8x384xf32>
    %cst_31 = arith.constant dense<0.000000e+00> : vector<8xf32>
    %38 = vector.multi_reduction <add>, %37, %cst_31 [1] : vector<8x384xf32> to vector<8xf32>
    %39 = vector.shape_cast %38 : vector<8xf32> to vector<8x1xf32>
    %40 = arith.addf %2, %39 : vector<8x1xf32>
    %cst_32 = arith.constant 0.000000e+00 : f32
    %41 = vector.broadcast %cst_32 : f32 to vector<8x384xf32>
    %c0_33 = arith.constant 0 : index
    %c0_34 = arith.constant 0 : index
    %c1_35 = arith.constant 1 : index
    %42 = vector.load %arg1[%c0_33, %c0_34, %c1_35] : memref<1x4x512xbf16, #tpu.memory_space<vmem>>, vector<1x4x384xbf16>
    %43 = vector.shape_cast %42 : vector<1x4x384xbf16> to vector<4x384xbf16>
    %c4 = arith.constant 4 : index
    %c0_36 = arith.constant 0 : index
    %c0_37 = arith.constant 0 : index
    %44 = vector.load %arg2[%c4, %c0_36, %c0_37] : memref<16x8x4xbf16, #tpu.memory_space<vmem>>, vector<1x8x4xbf16>
    %45 = vector.shape_cast %44 : vector<1x8x4xbf16> to vector<8x4xbf16>
    %cst_38 = arith.constant dense<0.000000e+00> : vector<8x384xf32>
    %46 = tpu.matmul %45, %43, %cst_38 {dimension_numbers = #tpu.dot_dimension_numbers<[1], [0], [0], [1], [0, 0, 1, 1], [], []>} : vector<8x4xbf16>, vector<4x384xbf16>, vector<8x384xf32> -> vector<8x384xf32>
    %47 = arith.addf %41, %46 : vector<8x384xf32>
    %c0_39 = arith.constant 0 : index
    %c0_40 = arith.constant 0 : index
    %c2_41 = arith.constant 2 : index
    %48 = vector.load %arg1[%c0_39, %c0_40, %c2_41] : memref<1x4x512xbf16, #tpu.memory_space<vmem>>, vector<1x4x384xbf16>
    %49 = vector.shape_cast %48 : vector<1x4x384xbf16> to vector<4x384xbf16>
    %c5 = arith.constant 5 : index
    %c0_42 = arith.constant 0 : index
    %c0_43 = arith.constant 0 : index
    %50 = vector.load %arg2[%c5, %c0_42, %c0_43] : memref<16x8x4xbf16, #tpu.memory_space<vmem>>, vector<1x8x4xbf16>
    %51 = vector.shape_cast %50 : vector<1x8x4xbf16> to vector<8x4xbf16>
    %cst_44 = arith.constant dense<0.000000e+00> : vector<8x384xf32>
    %52 = tpu.matmul %51, %49, %cst_44 {dimension_numbers = #tpu.dot_dimension_numbers<[1], [0], [0], [1], [0, 0, 1, 1], [], []>} : vector<8x4xbf16>, vector<4x384xbf16>, vector<8x384xf32> -> vector<8x384xf32>
    %53 = arith.addf %47, %52 : vector<8x384xf32>
    %c0_45 = arith.constant 0 : index
    %c0_46 = arith.constant 0 : index
    %c19_47 = arith.constant 19 : index
    %54 = vector.load %arg1[%c0_45, %c0_46, %c19_47] : memref<1x4x512xbf16, #tpu.memory_space<vmem>>, vector<1x4x384xbf16>
    %55 = vector.shape_cast %54 : vector<1x4x384xbf16> to vector<4x384xbf16>
    %c6 = arith.constant 6 : index
    %c0_48 = arith.constant 0 : index
    %c0_49 = arith.constant 0 : index
    %56 = vector.load %arg2[%c6, %c0_48, %c0_49] : memref<16x8x4xbf16, #tpu.memory_space<vmem>>, vector<1x8x4xbf16>
    %57 = vector.shape_cast %56 : vector<1x8x4xbf16> to vector<8x4xbf16>
    %cst_50 = arith.constant dense<0.000000e+00> : vector<8x384xf32>
    %58 = tpu.matmul %57, %55, %cst_50 {dimension_numbers = #tpu.dot_dimension_numbers<[1], [0], [0], [1], [0, 0, 1, 1], [], []>} : vector<8x4xbf16>, vector<4x384xbf16>, vector<8x384xf32> -> vector<8x384xf32>
    %59 = arith.addf %53, %58 : vector<8x384xf32>
    %c0_51 = arith.constant 0 : index
    %c0_52 = arith.constant 0 : index
    %c20 = arith.constant 20 : index
    %60 = vector.load %arg1[%c0_51, %c0_52, %c20] : memref<1x4x512xbf16, #tpu.memory_space<vmem>>, vector<1x4x384xbf16>
    %61 = vector.shape_cast %60 : vector<1x4x384xbf16> to vector<4x384xbf16>
    %c7 = arith.constant 7 : index
    %c0_53 = arith.constant 0 : index
    %c0_54 = arith.constant 0 : index
    %62 = vector.load %arg2[%c7, %c0_53, %c0_54] : memref<16x8x4xbf16, #tpu.memory_space<vmem>>, vector<1x8x4xbf16>
    %63 = vector.shape_cast %62 : vector<1x8x4xbf16> to vector<8x4xbf16>
    %cst_55 = arith.constant dense<0.000000e+00> : vector<8x384xf32>
    %64 = tpu.matmul %63, %61, %cst_55 {dimension_numbers = #tpu.dot_dimension_numbers<[1], [0], [0], [1], [0, 0, 1, 1], [], []>} : vector<8x4xbf16>, vector<4x384xbf16>, vector<8x384xf32> -> vector<8x384xf32>
    %65 = arith.addf %59, %64 : vector<8x384xf32>
    %66 = arith.truncf %65 : vector<8x384xf32> to vector<8x384xbf16>
    %c0_56 = arith.constant 0 : index
    %c1_57 = arith.constant 1 : index
    %c0_58 = arith.constant 0 : index
    %c0_59 = arith.constant 0 : index
    %67 = vector.load %arg4[%c0_56, %c1_57, %c0_58, %c0_59] : memref<1x4x8x384xbf16, #tpu.memory_space<vmem>>, vector<1x1x8x384xbf16>
    %68 = vector.shape_cast %67 : vector<1x1x8x384xbf16> to vector<8x384xbf16>
    %69 = vector.shape_cast %66 : vector<8x384xbf16> to vector<1x1x8x384xbf16>
    tpu.vector_store %arg4[%c0_56, %c1_57, %c0_58, %c0_59], %69 {strides = array<i32>} : memref<1x4x8x384xbf16, #tpu.memory_space<vmem>>, vector<1x1x8x384xbf16>,
    %70 = vector.broadcast %0 : vector<1x384xf32> to vector<8x384xf32>
    %71 = arith.mulf %65, %70 : vector<8x384xf32>
    %cst_60 = arith.constant dense<0.000000e+00> : vector<8xf32>
    %72 = vector.multi_reduction <add>, %71, %cst_60 [1] : vector<8x384xf32> to vector<8xf32>
    %73 = vector.shape_cast %72 : vector<8xf32> to vector<8x1xf32>
    %74 = arith.addf %36, %73 : vector<8x1xf32>
    %75 = arith.mulf %65, %71 : vector<8x384xf32>
    %cst_61 = arith.constant dense<0.000000e+00> : vector<8xf32>
    %76 = vector.multi_reduction <add>, %75, %cst_61 [1] : vector<8x384xf32> to vector<8xf32>
    %77 = vector.shape_cast %76 : vector<8xf32> to vector<8x1xf32>
    %78 = arith.addf %40, %77 : vector<8x1xf32>
    %cst_62 = arith.constant 0.000000e+00 : f32
    %79 = vector.broadcast %cst_62 : f32 to vector<8x384xf32>
    %c0_63 = arith.constant 0 : index
    %c0_64 = arith.constant 0 : index
    %c18_65 = arith.constant 18 : index
    %80 = vector.load %arg1[%c0_63, %c0_64, %c18_65] : memref<1x4x512xbf16, #tpu.memory_space<vmem>>, vector<1x4x384xbf16>
    %81 = vector.shape_cast %80 : vector<1x4x384xbf16> to vector<4x384xbf16>
    %c8 = arith.constant 8 : index
    %c0_66 = arith.constant 0 : index
    %c0_67 = arith.constant 0 : index
    %82 = vector.load %arg2[%c8, %c0_66, %c0_67] : memref<16x8x4xbf16, #tpu.memory_space<vmem>>, vector<1x8x4xbf16>
    %83 = vector.shape_cast %82 : vector<1x8x4xbf16> to vector<8x4xbf16>
    %cst_68 = arith.constant dense<0.000000e+00> : vector<8x384xf32>
    %84 = tpu.matmul %83, %81, %cst_68 {dimension_numbers = #tpu.dot_dimension_numbers<[1], [0], [0], [1], [0, 0, 1, 1], [], []>} : vector<8x4xbf16>, vector<4x384xbf16>, vector<8x384xf32> -> vector<8x384xf32>
    %85 = arith.addf %79, %84 : vector<8x384xf32>
    %c0_69 = arith.constant 0 : index
    %c0_70 = arith.constant 0 : index
    %c19_71 = arith.constant 19 : index
    %86 = vector.load %arg1[%c0_69, %c0_70, %c19_71] : memref<1x4x512xbf16, #tpu.memory_space<vmem>>, vector<1x4x384xbf16>
    %87 = vector.shape_cast %86 : vector<1x4x384xbf16> to vector<4x384xbf16>
    %c9 = arith.constant 9 : index
    %c0_72 = arith.constant 0 : index
    %c0_73 = arith.constant 0 : index
    %88 = vector.load %arg2[%c9, %c0_72, %c0_73] : memref<16x8x4xbf16, #tpu.memory_space<vmem>>, vector<1x8x4xbf16>
    %89 = vector.shape_cast %88 : vector<1x8x4xbf16> to vector<8x4xbf16>
    %cst_74 = arith.constant dense<0.000000e+00> : vector<8x384xf32>
    %90 = tpu.matmul %89, %87, %cst_74 {dimension_numbers = #tpu.dot_dimension_numbers<[1], [0], [0], [1], [0, 0, 1, 1], [], []>} : vector<8x4xbf16>, vector<4x384xbf16>, vector<8x384xf32> -> vector<8x384xf32>
    %91 = arith.addf %85, %90 : vector<8x384xf32>
    %c0_75 = arith.constant 0 : index
    %c0_76 = arith.constant 0 : index
    %c36 = arith.constant 36 : index
    %92 = vector.load %arg1[%c0_75, %c0_76, %c36] : memref<1x4x512xbf16, #tpu.memory_space<vmem>>, vector<1x4x384xbf16>
    %93 = vector.shape_cast %92 : vector<1x4x384xbf16> to vector<4x384xbf16>
    %c10 = arith.constant 10 : index
    %c0_77 = arith.constant 0 : index
    %c0_78 = arith.constant 0 : index
    %94 = vector.load %arg2[%c10, %c0_77, %c0_78] : memref<16x8x4xbf16, #tpu.memory_space<vmem>>, vector<1x8x4xbf16>
    %95 = vector.shape_cast %94 : vector<1x8x4xbf16> to vector<8x4xbf16>
    %cst_79 = arith.constant dense<0.000000e+00> : vector<8x384xf32>
    %96 = tpu.matmul %95, %93, %cst_79 {dimension_numbers = #tpu.dot_dimension_numbers<[1], [0], [0], [1], [0, 0, 1, 1], [], []>} : vector<8x4xbf16>, vector<4x384xbf16>, vector<8x384xf32> -> vector<8x384xf32>
    %97 = arith.addf %91, %96 : vector<8x384xf32>
    %c0_80 = arith.constant 0 : index
    %c0_81 = arith.constant 0 : index
    %c37 = arith.constant 37 : index
    %98 = vector.load %arg1[%c0_80, %c0_81, %c37] : memref<1x4x512xbf16, #tpu.memory_space<vmem>>, vector<1x4x384xbf16>
    %99 = vector.shape_cast %98 : vector<1x4x384xbf16> to vector<4x384xbf16>
    %c11 = arith.constant 11 : index
    %c0_82 = arith.constant 0 : index
    %c0_83 = arith.constant 0 : index
    %100 = vector.load %arg2[%c11, %c0_82, %c0_83] : memref<16x8x4xbf16, #tpu.memory_space<vmem>>, vector<1x8x4xbf16>
    %101 = vector.shape_cast %100 : vector<1x8x4xbf16> to vector<8x4xbf16>
    %cst_84 = arith.constant dense<0.000000e+00> : vector<8x384xf32>
    %102 = tpu.matmul %101, %99, %cst_84 {dimension_numbers = #tpu.dot_dimension_numbers<[1], [0], [0], [1], [0, 0, 1, 1], [], []>} : vector<8x4xbf16>, vector<4x384xbf16>, vector<8x384xf32> -> vector<8x384xf32>
    %103 = arith.addf %97, %102 : vector<8x384xf32>
    %104 = arith.truncf %103 : vector<8x384xf32> to vector<8x384xbf16>
    %c0_85 = arith.constant 0 : index
    %c2_86 = arith.constant 2 : index
    %c0_87 = arith.constant 0 : index
    %c0_88 = arith.constant 0 : index
    %105 = vector.load %arg4[%c0_85, %c2_86, %c0_87, %c0_88] : memref<1x4x8x384xbf16, #tpu.memory_space<vmem>>, vector<1x1x8x384xbf16>
    %106 = vector.shape_cast %105 : vector<1x1x8x384xbf16> to vector<8x384xbf16>
    %107 = vector.shape_cast %104 : vector<8x384xbf16> to vector<1x1x8x384xbf16>
    tpu.vector_store %arg4[%c0_85, %c2_86, %c0_87, %c0_88], %107 {strides = array<i32>} : memref<1x4x8x384xbf16, #tpu.memory_space<vmem>>, vector<1x1x8x384xbf16>,
    %108 = vector.broadcast %0 : vector<1x384xf32> to vector<8x384xf32>
    %109 = arith.mulf %103, %108 : vector<8x384xf32>
    %cst_89 = arith.constant dense<0.000000e+00> : vector<8xf32>
    %110 = vector.multi_reduction <add>, %109, %cst_89 [1] : vector<8x384xf32> to vector<8xf32>
    %111 = vector.shape_cast %110 : vector<8xf32> to vector<8x1xf32>
    %112 = arith.addf %74, %111 : vector<8x1xf32>
    %113 = arith.mulf %103, %109 : vector<8x384xf32>
    %cst_90 = arith.constant dense<0.000000e+00> : vector<8xf32>
    %114 = vector.multi_reduction <add>, %113, %cst_90 [1] : vector<8x384xf32> to vector<8xf32>
    %115 = vector.shape_cast %114 : vector<8xf32> to vector<8x1xf32>
    %116 = arith.addf %78, %115 : vector<8x1xf32>
    %cst_91 = arith.constant 0.000000e+00 : f32
    %117 = vector.broadcast %cst_91 : f32 to vector<8x384xf32>
    %c0_92 = arith.constant 0 : index
    %c0_93 = arith.constant 0 : index
    %c19_94 = arith.constant 19 : index
    %118 = vector.load %arg1[%c0_92, %c0_93, %c19_94] : memref<1x4x512xbf16, #tpu.memory_space<vmem>>, vector<1x4x384xbf16>
    %119 = vector.shape_cast %118 : vector<1x4x384xbf16> to vector<4x384xbf16>
    %c12 = arith.constant 12 : index
    %c0_95 = arith.constant 0 : index
    %c0_96 = arith.constant 0 : index
    %120 = vector.load %arg2[%c12, %c0_95, %c0_96] : memref<16x8x4xbf16, #tpu.memory_space<vmem>>, vector<1x8x4xbf16>
    %121 = vector.shape_cast %120 : vector<1x8x4xbf16> to vector<8x4xbf16>
    %cst_97 = arith.constant dense<0.000000e+00> : vector<8x384xf32>
    %122 = tpu.matmul %121, %119, %cst_97 {dimension_numbers = #tpu.dot_dimension_numbers<[1], [0], [0], [1], [0, 0, 1, 1], [], []>} : vector<8x4xbf16>, vector<4x384xbf16>, vector<8x384xf32> -> vector<8x384xf32>
    %123 = arith.addf %117, %122 : vector<8x384xf32>
    %c0_98 = arith.constant 0 : index
    %c0_99 = arith.constant 0 : index
    %c20_100 = arith.constant 20 : index
    %124 = vector.load %arg1[%c0_98, %c0_99, %c20_100] : memref<1x4x512xbf16, #tpu.memory_space<vmem>>, vector<1x4x384xbf16>
    %125 = vector.shape_cast %124 : vector<1x4x384xbf16> to vector<4x384xbf16>
    %c13 = arith.constant 13 : index
    %c0_101 = arith.constant 0 : index
    %c0_102 = arith.constant 0 : index
    %126 = vector.load %arg2[%c13, %c0_101, %c0_102] : memref<16x8x4xbf16, #tpu.memory_space<vmem>>, vector<1x8x4xbf16>
    %127 = vector.shape_cast %126 : vector<1x8x4xbf16> to vector<8x4xbf16>
    %cst_103 = arith.constant dense<0.000000e+00> : vector<8x384xf32>
    %128 = tpu.matmul %127, %125, %cst_103 {dimension_numbers = #tpu.dot_dimension_numbers<[1], [0], [0], [1], [0, 0, 1, 1], [], []>} : vector<8x4xbf16>, vector<4x384xbf16>, vector<8x384xf32> -> vector<8x384xf32>
    %129 = arith.addf %123, %128 : vector<8x384xf32>
    %c0_104 = arith.constant 0 : index
    %c0_105 = arith.constant 0 : index
    %c37_106 = arith.constant 37 : index
    %130 = vector.load %arg1[%c0_104, %c0_105, %c37_106] : memref<1x4x512xbf16, #tpu.memory_space<vmem>>, vector<1x4x384xbf16>
    %131 = vector.shape_cast %130 : vector<1x4x384xbf16> to vector<4x384xbf16>
    %c14 = arith.constant 14 : index
    %c0_107 = arith.constant 0 : index
    %c0_108 = arith.constant 0 : index
    %132 = vector.load %arg2[%c14, %c0_107, %c0_108] : memref<16x8x4xbf16, #tpu.memory_space<vmem>>, vector<1x8x4xbf16>
    %133 = vector.shape_cast %132 : vector<1x8x4xbf16> to vector<8x4xbf16>
    %cst_109 = arith.constant dense<0.000000e+00> : vector<8x384xf32>
    %134 = tpu.matmul %133, %131, %cst_109 {dimension_numbers = #tpu.dot_dimension_numbers<[1], [0], [0], [1], [0, 0, 1, 1], [], []>} : vector<8x4xbf16>, vector<4x384xbf16>, vector<8x384xf32> -> vector<8x384xf32>
    %135 = arith.addf %129, %134 : vector<8x384xf32>
    %c0_110 = arith.constant 0 : index
    %c0_111 = arith.constant 0 : index
    %c38 = arith.constant 38 : index
    %136 = vector.load %arg1[%c0_110, %c0_111, %c38] : memref<1x4x512xbf16, #tpu.memory_space<vmem>>, vector<1x4x384xbf16>
    %137 = vector.shape_cast %136 : vector<1x4x384xbf16> to vector<4x384xbf16>
    %c15 = arith.constant 15 : index
    %c0_112 = arith.constant 0 : index
    %c0_113 = arith.constant 0 : index
    %138 = vector.load %arg2[%c15, %c0_112, %c0_113] : memref<16x8x4xbf16, #tpu.memory_space<vmem>>, vector<1x8x4xbf16>
    %139 = vector.shape_cast %138 : vector<1x8x4xbf16> to vector<8x4xbf16>
    %cst_114 = arith.constant dense<0.000000e+00> : vector<8x384xf32>
    %140 = tpu.matmul %139, %137, %cst_114 {dimension_numbers = #tpu.dot_dimension_numbers<[1], [0], [0], [1], [0, 0, 1, 1], [], []>} : vector<8x4xbf16>, vector<4x384xbf16>, vector<8x384xf32> -> vector<8x384xf32>
    %141 = arith.addf %135, %140 : vector<8x384xf32>
    %142 = arith.truncf %141 : vector<8x384xf32> to vector<8x384xbf16>
    %c0_115 = arith.constant 0 : index
    %c3_116 = arith.constant 3 : index
    %c0_117 = arith.constant 0 : index
    %c0_118 = arith.constant 0 : index
    %143 = vector.load %arg4[%c0_115, %c3_116, %c0_117, %c0_118] : memref<1x4x8x384xbf16, #tpu.memory_space<vmem>>, vector<1x1x8x384xbf16>
    %144 = vector.shape_cast %143 : vector<1x1x8x384xbf16> to vector<8x384xbf16>
    %145 = vector.shape_cast %142 : vector<8x384xbf16> to vector<1x1x8x384xbf16>
    tpu.vector_store %arg4[%c0_115, %c3_116, %c0_117, %c0_118], %145 {strides = array<i32>} : memref<1x4x8x384xbf16, #tpu.memory_space<vmem>>, vector<1x1x8x384xbf16>,
    %146 = vector.broadcast %0 : vector<1x384xf32> to vector<8x384xf32>
    %147 = arith.mulf %141, %146 : vector<8x384xf32>
    %cst_119 = arith.constant dense<0.000000e+00> : vector<8xf32>
    %148 = vector.multi_reduction <add>, %147, %cst_119 [1] : vector<8x384xf32> to vector<8xf32>
    %149 = vector.shape_cast %148 : vector<8xf32> to vector<8x1xf32>
    %150 = arith.addf %112, %149 : vector<8x1xf32>
    %151 = arith.mulf %141, %147 : vector<8x384xf32>
    %cst_120 = arith.constant dense<0.000000e+00> : vector<8xf32>
    %152 = vector.multi_reduction <add>, %151, %cst_120 [1] : vector<8x384xf32> to vector<8xf32>
    %153 = vector.shape_cast %152 : vector<8xf32> to vector<8x1xf32>
    %154 = arith.addf %116, %153 : vector<8x1xf32>
    %c0_121 = arith.constant 0 : index
    %c0_122 = arith.constant 0 : index
    %c0_123 = arith.constant 0 : index
    %155 = vector.load %arg5[%c0_121, %c0_122, %c0_123] : memref<1x8x1xf32, #tpu.memory_space<vmem>>, vector<1x8x1xf32>
    %156 = vector.shape_cast %155 : vector<1x8x1xf32> to vector<8x1xf32>
    %157 = vector.shape_cast %150 : vector<8x1xf32> to vector<1x8x1xf32>
    tpu.vector_store %arg5[%c0_121, %c0_122, %c0_123], %157 {strides = array<i32>} : memref<1x8x1xf32, #tpu.memory_space<vmem>>, vector<1x8x1xf32>,
    %c0_124 = arith.constant 0 : index
    %c0_125 = arith.constant 0 : index
    %c0_126 = arith.constant 0 : index
    %158 = vector.load %arg6[%c0_124, %c0_125, %c0_126] : memref<1x8x1xf32, #tpu.memory_space<vmem>>, vector<1x8x1xf32>
    %159 = vector.shape_cast %158 : vector<1x8x1xf32> to vector<8x1xf32>
    %160 = vector.shape_cast %154 : vector<8x1xf32> to vector<1x8x1xf32>
    tpu.vector_store %arg6[%c0_124, %c0_125, %c0_126], %160 {strides = array<i32>} : memref<1x8x1xf32, #tpu.memory_space<vmem>>, vector<1x8x1xf32>,
    return
  }
  func.func @transform_0(%arg0: i32) -> (i32, i32, i32) {
    %c0_i32 = arith.constant 0 : i32
    %c0_i32_0 = arith.constant 0 : i32
    %c0_i32_1 = arith.constant 0 : i32
    return %arg0, %c0_i32, %c0_i32_0 : i32, i32, i32
  }
  func.func @transform_1(%arg0: i32) -> (i32, i32, i32) {
    %c0_i32 = arith.constant 0 : i32
    %c0_i32_0 = arith.constant 0 : i32
    %c0_i32_1 = arith.constant 0 : i32
    %c0_i32_2 = arith.constant 0 : i32
    return %c0_i32, %c0_i32_0, %c0_i32_1 : i32, i32, i32
  }
  func.func @transform_2(%arg0: i32) -> (i32, i32) {
    %c0_i32 = arith.constant 0 : i32
    %c0_i32_0 = arith.constant 0 : i32
    %c0_i32_1 = arith.constant 0 : i32
    return %c0_i32, %c0_i32_0 : i32, i32
  }
  func.func @transform_3(%arg0: i32) -> (i32, i32, i32, i32) {
    %c0_i32 = arith.constant 0 : i32
    %c0_i32_0 = arith.constant 0 : i32
    %c0_i32_1 = arith.constant 0 : i32
    %c0_i32_2 = arith.constant 0 : i32
    return %arg0, %c0_i32, %c0_i32_0, %c0_i32_1 : i32, i32, i32, i32
  }
  func.func @transform_4(%arg0: i32) -> (i32, i32, i32) {
    %c0_i32 = arith.constant 0 : i32
    %c0_i32_0 = arith.constant 0 : i32
    %c0_i32_1 = arith.constant 0 : i32
    return %arg0, %c0_i32, %c0_i32_0 : i32, i32, i32
  }
  func.func @transform_5(%arg0: i32) -> (i32, i32, i32) {
    %c0_i32 = arith.constant 0 : i32
    %c0_i32_0 = arith.constant 0 : i32
    %c0_i32_1 = arith.constant 0 : i32
    return %arg0, %c0_i32, %c0_i32_0 : i32, i32, i32
  }
}

module attributes {stable_mosaic.version = 11 : i64} {
  func.func @bn_lrelu_kernel(%arg0: i32, %arg1: memref<1x8x384xbf16, #tpu.memory_space<vmem>>, %arg2: memref<8x1xf32, #tpu.memory_space<vmem>>, %arg3: memref<8x1xf32, #tpu.memory_space<vmem>>, %arg4: memref<1x8x384xf32, #tpu.memory_space<vmem>>) attributes {dimension_semantics = [#tpu.dimension_semantics<parallel>], iteration_bounds = array<i64: 8>, scalar_prefetch = 0 : i64, scratch_operands = 0 : i64, tpu.core_type = #tpu.core_type<tc>, window_params = [{transform_indices = @transform_0, window_bounds = array<i64: 1, 8, 384>}, {pipeline_mode = #tpu.pipeline_mode<synchronous>, transform_indices = @transform_1, window_bounds = array<i64: 8, 1>}, {pipeline_mode = #tpu.pipeline_mode<synchronous>, transform_indices = @transform_2, window_bounds = array<i64: 8, 1>}, {transform_indices = @transform_3, window_bounds = array<i64: 1, 8, 384>}]} {
    %c0 = arith.constant 0 : index
    %c0_0 = arith.constant 0 : index
    %c0_1 = arith.constant 0 : index
    %0 = vector.load %arg1[%c0, %c0_0, %c0_1] : memref<1x8x384xbf16, #tpu.memory_space<vmem>>, vector<1x8x384xbf16>
    %1 = vector.shape_cast %0 : vector<1x8x384xbf16> to vector<8x384xbf16>
    %2 = arith.extf %1 : vector<8x384xbf16> to vector<8x384xf32>
    %c0_2 = arith.constant 0 : index
    %c0_3 = arith.constant 0 : index
    %3 = vector.load %arg2[%c0_2, %c0_3] : memref<8x1xf32, #tpu.memory_space<vmem>>, vector<8x1xf32>
    %4 = vector.broadcast %3 : vector<8x1xf32> to vector<8x384xf32>
    %5 = arith.mulf %2, %4 : vector<8x384xf32>
    %c0_4 = arith.constant 0 : index
    %c0_5 = arith.constant 0 : index
    %6 = vector.load %arg3[%c0_4, %c0_5] : memref<8x1xf32, #tpu.memory_space<vmem>>, vector<8x1xf32>
    %7 = vector.broadcast %6 : vector<8x1xf32> to vector<8x384xf32>
    %8 = arith.addf %5, %7 : vector<8x384xf32>
    %cst = arith.constant 0.000000e+00 : f32
    %9 = vector.broadcast %cst : f32 to vector<8x384xf32>
    %10 = arith.cmpf oge, %8, %9 : vector<8x384xf32>
    %cst_6 = arith.constant 2.000000e-01 : f32
    %11 = vector.broadcast %cst_6 : f32 to vector<8x384xf32>
    %12 = arith.mulf %11, %8 : vector<8x384xf32>
    %13 = arith.select %10, %8, %12 : vector<8x384xi1>, vector<8x384xf32>
    %c0_7 = arith.constant 0 : index
    %c0_8 = arith.constant 0 : index
    %c0_9 = arith.constant 0 : index
    %14 = vector.load %arg4[%c0_7, %c0_8, %c0_9] : memref<1x8x384xf32, #tpu.memory_space<vmem>>, vector<1x8x384xf32>
    %15 = vector.shape_cast %14 : vector<1x8x384xf32> to vector<8x384xf32>
    %16 = vector.shape_cast %13 : vector<8x384xf32> to vector<1x8x384xf32>
    tpu.vector_store %arg4[%c0_7, %c0_8, %c0_9], %16 {strides = array<i32>} : memref<1x8x384xf32, #tpu.memory_space<vmem>>, vector<1x8x384xf32>,
    return
  }
  func.func @transform_0(%arg0: i32) -> (i32, i32, i32) {
    %c0_i32 = arith.constant 0 : i32
    %c0_i32_0 = arith.constant 0 : i32
    %c0_i32_1 = arith.constant 0 : i32
    return %arg0, %c0_i32, %c0_i32_0 : i32, i32, i32
  }
  func.func @transform_1(%arg0: i32) -> (i32, i32) {
    %c0_i32 = arith.constant 0 : i32
    %c0_i32_0 = arith.constant 0 : i32
    %c0_i32_1 = arith.constant 0 : i32
    return %c0_i32, %c0_i32_0 : i32, i32
  }
  func.func @transform_2(%arg0: i32) -> (i32, i32) {
    %c0_i32 = arith.constant 0 : i32
    %c0_i32_0 = arith.constant 0 : i32
    %c0_i32_1 = arith.constant 0 : i32
    return %c0_i32, %c0_i32_0 : i32, i32
  }
  func.func @transform_3(%arg0: i32) -> (i32, i32, i32) {
    %c0_i32 = arith.constant 0 : i32
    %c0_i32_0 = arith.constant 0 : i32
    %c0_i32_1 = arith.constant 0 : i32
    return %arg0, %c0_i32, %c0_i32_0 : i32, i32, i32
  }
}

</mosaic_0001>

<bundles_post_ra>
// kernel: block_forward.3
= control target key start
LH: loop header
LB: loop body
LE: loop exit
PB: predicated region body
PF: predicated region fallthrough
CT: control target
= control target key end

     0   :  { %s311_s12 = smov 0   ;;  %s334_s0 = inlined_call_operand.vmem [shape: bf16[8,8,384], index: 0, kind: input, shape index: {}]   ;;  %s335_s1 = inlined_call_operand.vmem [shape: f32[8,1], index: 1, kind: input, shape index: {}]   ;;  %s336_s2 = inlined_call_operand.vmem [shape: f32[8,1], index: 2, kind: input, shape index: {}]   ;;  %s337_s3 = inlined_call_operand.vmem [shape: f32[8,8,384], index: 3, kind: output, shape index: {}]  }
   0x1 LB: > { %s261_s13 = sadd.s32 4294967295, %s288_s12   ;;  %p265_p0 = scmp.ge.s32.totalorder %s288_s12, 1  ;;  %s288_s12 = sphi %s311_s12, %s13_s12  }
   0x2   : > { %p137_p1 = scmp.lt.s32.totalorder %s288_s12, 9 }
   0x4   : > { %p138_p2 = pnand %p265_p0, %p137_p1 }
   0x5   : > { %p161_p3 = scmp.lt.s32.totalorder (!%p138_p2), %s261_s13, 7 }
   0x6   : > { %141 = sbr.rel (%p138_p2) target bundleno = 148 (0x94), region = 32 }
   0xb   : > { %v176_v0 = vld [vmem:[%s335_s1] sm:$0xff]  ;;  %v290_v1 = vmov 0   ;;  %s339_s13 = smov (!%p161_p3, %s261_s13), 7 }
   0xc   : > { %281 = vset.pattern.permute.xlu0 %v290_v1  ;;  %v185_v2 = vld [vmem:[%s336_s2] sm:$0xff]  ;;  %s270_s18 = smul.u32 12, %s339_s13 }
   0xd   : > { %179 = vperm.xlu0 %281, %v176_v0   ;;  %s271_s22 = smul.u32 24, %s339_s13 }
   0xe   : > { %s165_s21 = scalar_lea.vmem %s334_s0, %s270_s18 }
   0xf   : > { %v171_v3 = vld [vmem:[%s165_s21] sm:$0xff]  ;;  %v172_v4 = vld [vmem:[%s165_s21 + $0x8] sm:$0xf]  ;;  %s170_s25 = scalar_lea.vmem %s337_s3, %s271_s22 }
  0x10   : > { %v173_v5 = vunpack.c.l.bf16 %v171_v3  ;;  %v174_v6 = vunpack.c.h.bf16 %v171_v3  ;;  %v175_v7 = vunpack.c.l.bf16 %v172_v4 }
  0x11   : > { %188 = vperm.xlu0 %281, %v185_v2  }
  0x88   : > { %v180_v8 = vpop.permute.xlu0 %179 }
  0x89   : > { %v182_v9 = vmul.f32 %v180_v8, %v173_v5  ;;  %v183_v10 = vmul.f32 %v180_v8, %v174_v6  ;;  %v184_v11 = vmul.f32 %v180_v8, %v175_v7 }
  0x8c   : > { %v189_v12 = vpop.permute.xlu0 %188 }
  0x8d   : > { %v191_v13 = vadd.f32 %v189_v12, %v182_v9  ;;  %v192_v14 = vadd.f32 %v189_v12, %v183_v10  ;;  %v193_v15 = vadd.f32 %v189_v12, %v184_v11 }
  0x8f   : > { %vm194_vm0 = vcmp.ge.f32.partialorder %v191_v13, 0.0  ;;  %vm195_vm1 = vcmp.ge.f32.partialorder %v192_v14, 0.0  ;;  %vm196_vm2 = vcmp.ge.f32.partialorder %v193_v15, 0.0  ;;  %v197_v16 = vmul.f32 0.2, %v191_v13 }
  0x90   : > { %v198_v17 = vmul.f32 0.2, %v192_v14  ;;  %v199_v18 = vmul.f32 0.2, %v193_v15 }
  0x91   : > { %v200_v19 = vsel %vm194_vm0, %v191_v13, %v197_v16 }
  0x92   : > { %v201_v20 = vsel %vm195_vm1, %v192_v14, %v198_v17  ;;  %v202_v21 = vsel %vm196_vm2, %v193_v15, %v199_v18  ;;  %203 = vst [vmem:[%s170_s25] sm:$0xff] %v200_v19 }
  0x93   : > { %204 = vst [vmem:[%s170_s25 + $0x8] sm:$0xff] %v201_v20  ;;  %205 = vst [vmem:[%s170_s25 + $0x10] sm:$0xff] %v202_v21 }
  0x94 PF: > { %s13_s12 = sadd.s32 1, %s288_s12  }
  0x95   : > { %p10_p4 = scmp.ge.s32.totalorder %s13_s12, 10  }
  0x97   :  { %12 = sbr.rel (!%p10_p4) target bundleno = 1 (0x1), region = 62 }

// kernel: block_forward.2
= control target key start
LH: loop header
LB: loop body
LE: loop exit
PB: predicated region body
PF: predicated region fallthrough
CT: control target
= control target key end

     0   :  { %s2774_s18 = smov 0   ;;  %s3175_s0 = inlined_call_operand.vmem [shape: bf16[2,4,512], index: 0, kind: input, shape index: {}]   ;;  %s3176_s1 = inlined_call_operand.vmem [shape: bf16[16,8,4], index: 1, kind: input, shape index: {}]   ;;  %s3177_s2 = inlined_call_operand.vmem [shape: f32[1,384], index: 2, kind: input, shape index: {}]   ;;  %s3178_s3 = inlined_call_operand.vmem [shape: bf16[2,4,8,384], index: 3, kind: output, shape index: {0}]   ;;  %s3179_s4 = inlined_call_operand.vmem [shape: f32[2,8,1], index: 4, kind: output, shape index: {1}]   ;;  %s3180_s5 = inlined_call_operand.vmem [shape: f32[2,8,1], index: 5, kind: output, shape index: {2}]  }
   0x1 LB: > { %s2475_s19 = sadd.s32 4294967295, %s2730_s18   ;;  %p2479_p0 = scmp.ge.s32.totalorder %s2730_s18, 1  ;;  %s2730_s18 = sphi %s2774_s18, %s16_s18  }
   0x2   : > { %p192_p1 = scmp.lt.s32.totalorder %s2730_s18, 3 }
   0x4   : > { %p193_p2 = pnand %p2479_p0, %p192_p1 }
   0x5   : > { %p228_p3 = scmp.lt.s32.totalorder (!%p193_p2), %s2475_s19, 1  ;;  %s2736_s24 = smov (!%p193_p2), 127  }
   0x6   : > { %196 = sbr.rel (%p193_p2) target bundleno = 610 (0x262), region = 32  ;;  %s2737_s25 = smov (!%p193_p2), 110  }
   0x7   : > { %s2738_s26 = smov (!%p193_p2), 109   ;;  %s2739_s27 = smov (!%p193_p2), 126  }
   0x8   : > { %s2740_s28 = smov (!%p193_p2), 108   ;;  %s2741_s29 = smov (!%p193_p2), 92  }
   0x9   : > { %s2742_s30 = smov (!%p193_p2), 91   ;;  %s2743_s6 = smov (!%p193_p2), 90  }
   0xb   : > { %v258_v0 = vlaneseq  ;;  %v2732_v1 = vmov 1983009808   ;;  %s3182_s19 = smov (!%p228_p3, %s2475_s19), 1  ;;  %v2733_v5 = vmov 0.0   ;;  %v2734_v6 = vmov 0  }
   0xc   : > { %v256_v2 = vunpack.c.l.s4 %v2732_v1  ;;  %2605 = vmatprep.subr.bf16.mxu1 %v2733_v5  ;;  %329 = vmatprep.mubr.bf16.mxu0 %v2734_v6  ;;  %s2789_s20 = sshll.u32 %s3182_s19, 3  ;;  %vm2735_vm0 = vmmov 0   ;;  %vm279_vm1 = vcmask 1039360   ;;  %vm287_vm2 = vcmask 1041408   ;;  %v2485_v27 = vld [vmem:[%s3176_s1 + $0x4] sm:$0xf] }
   0xd   : > { %v2784_v3 = vshrl.u32 %v258_v0, 7  ;;  %s232_s23 = scalar_lea.vmem %s3175_s0, %s2789_s20  ;;  %2607 = vmatprep.mubr.msk.bf16.mxu1 %vm2735_vm0, %v2733_v5  ;;  %vm283_vm3 = vcmask 31744   ;;  %vm517_vm4 = vcmask 900096   ;;  %v249_v38 = vld [vmem:[%s3176_s1] sm:$0xf]  ;;  %vm646_vm5 = vcmask 891904  }
   0xe   : > { %v257_v4 = vunpack.c.0.s8 %v256_v2  ;;  %v250_v8 = vld [vmem:[%s232_s23] sm:$0xff]  ;;  %v2492_v48 = vld [vmem:[%s3176_s1 + $0x8] sm:$0xf]  ;;  %vm824_vm6 = vcmask 1031168   ;;  %v2496_v58 = vld [vmem:[%s3176_s1 + $0xc] sm:$0xf] }
   0xf   : > { %v248_v9 = vld [vmem:[%s232_s23] sm:$0x3f]  ;;  %v254_v11 = vcombine.high %v250_v8, %v250_v8  ;;  %vm1182_vm7 = vcmask 883712   ;;  %vm1574_vm8 = vcmask 752640   ;;  %vm1703_vm9 = vcmask 744448   ;;  %s2701_s22 = smul.u32 48, %s3182_s19 }
  0x10   : > { %v260_v7 = vsub.s32 %v257_v4, %v2784_v3  ;;  %v379_v13 = vcombine.high %v248_v9, %v248_v9  ;;  %vm2223_vm10 = vcmask 736256   ;;  %vm2355_vm11 = vcmask 7168  }
  0x12   : > { %v2798_v10 = vrot.slane %v250_v8, %v260_v7  ;;  %v2800_v12 = vrot.slane %v248_v9, %v260_v7  ;;  %v2807_v15 = vrot.slane %v254_v11, %v260_v7  ;;  %v2809_v16 = vrot.slane %v379_v13, %v260_v7  ;;  %v2503_v7 = vld [vmem:[%s3176_s1 + $0x14] sm:$0xf] }
  0x14   : > { %271 = vrot.lane.b32.xlu0 %v2798_v10, %s2736_s24  ;;  %v2805_v14 = vcombine.high %v2798_v10, %v2798_v10  ;;  %275 = vrot.lane.b32.xlu1 %v2807_v15, %s2736_s24  ;;  %v2814_v17 = vcombine.high %v2807_v15, %v2807_v15  ;;  %v394_v21 = vcombine.high %v2800_v12, %v2800_v12  ;;  %v399_v30 = vsel %vm287_vm2, %v2800_v12, 0 }
  0x15   : > { %v405_v32 = vsel %vm287_vm2, %v2809_v16, 0 }
  0x18   : > { %273 = vrot.lane.b32.xlu0 %v2805_v14, %s2736_s24  ;;  %277 = vrot.lane.b32.xlu1 %v2814_v17, %s2736_s24 }
  0x1c   : > { %509 = vrot.lane.b32.xlu0 %v2798_v10, %s2737_s25  ;;  %511 = vrot.lane.b32.xlu1 %v2805_v14, %s2737_s25 }
  0x20   : > { %513 = vrot.lane.b32.xlu0 %v2807_v15, %s2737_s25  ;;  %515 = vrot.lane.b32.xlu1 %v2814_v17, %s2737_s25 }
  0x24   : > { %638 = vrot.lane.b32.xlu0 %v2798_v10, %s2738_s26  ;;  %640 = vrot.lane.b32.xlu1 %v2805_v14, %s2738_s26 }
  0x28   : > { %642 = vrot.lane.b32.xlu0 %v2807_v15, %s2738_s26  ;;  %644 = vrot.lane.b32.xlu1 %v2814_v17, %s2738_s26 }
  0x2c   : > { %816 = vrot.lane.b32.xlu0 %v2798_v10, %s2739_s27  ;;  %818 = vrot.lane.b32.xlu1 %v2805_v14, %s2739_s27 }
  0x30   : > { %820 = vrot.lane.b32.xlu0 %v2807_v15, %s2739_s27  ;;  %822 = vrot.lane.b32.xlu1 %v2814_v17, %s2739_s27  ;;  %s241_s27 = scalar_lea.vmem %s3179_s4, %s2789_s20 }
  0x34   : > { %921 = vrot.lane.b32.xlu0 %v2798_v10, %s2736_s24  ;;  %923 = vrot.lane.b32.xlu1 %v2805_v14, %s2736_s24 }
  0x38   : > { %925 = vrot.lane.b32.xlu0 %v2807_v15, %s2736_s24  ;;  %927 = vrot.lane.b32.xlu1 %v2814_v17, %s2736_s24 }
  0x3c   : > { %1046 = vrot.lane.b32.xlu0 %v2798_v10, %s2738_s26  ;;  %1048 = vrot.lane.b32.xlu1 %v2805_v14, %s2738_s26 }
  0x40   : > { %1050 = vrot.lane.b32.xlu0 %v2807_v15, %s2738_s26  ;;  %1052 = vrot.lane.b32.xlu1 %v2814_v17, %s2738_s26 }
  0x44   : > { %1174 = vrot.lane.b32.xlu0 %v2798_v10, %s2740_s28  ;;  %1176 = vrot.lane.b32.xlu1 %v2805_v14, %s2740_s28 }
  0x48   : > { %1178 = vrot.lane.b32.xlu0 %v2807_v15, %s2740_s28  ;;  %1180 = vrot.lane.b32.xlu1 %v2814_v17, %s2740_s28 }
  0x4c   : > { %1337 = vrot.lane.b32.xlu0 %v2798_v10, %s2738_s26  ;;  %1339 = vrot.lane.b32.xlu1 %v2805_v14, %s2738_s26 }
  0x50   : > { %1341 = vrot.lane.b32.xlu0 %v2807_v15, %s2738_s26  ;;  %1343 = vrot.lane.b32.xlu1 %v2814_v17, %s2738_s26 }
  0x54   : > { %1441 = vrot.lane.b32.xlu0 %v2798_v10, %s2737_s25  ;;  %1443 = vrot.lane.b32.xlu1 %v2805_v14, %s2737_s25 }
  0x58   : > { %1445 = vrot.lane.b32.xlu0 %v2807_v15, %s2737_s25  ;;  %1447 = vrot.lane.b32.xlu1 %v2814_v17, %s2737_s25  ;;  %s3143_s25 = scalar_lea.vmem %s3178_s3, %s2701_s22 }
  0x5c   : > { %1566 = vrot.lane.b32.xlu0 %v2798_v10, %s2741_s29  ;;  %1568 = vrot.lane.b32.xlu1 %v2805_v14, %s2741_s29 }
  0x60   : > { %1570 = vrot.lane.b32.xlu0 %v2807_v15, %s2741_s29  ;;  %1572 = vrot.lane.b32.xlu1 %v2814_v17, %s2741_s29 }
  0x64   : > { %1695 = vrot.lane.b32.xlu0 %v2798_v10, %s2742_s30  ;;  %1697 = vrot.lane.b32.xlu1 %v2805_v14, %s2742_s30 }
  0x68   : > { %1699 = vrot.lane.b32.xlu0 %v2807_v15, %s2742_s30  ;;  %1701 = vrot.lane.b32.xlu1 %v2814_v17, %s2742_s30 }
  0x6c   : > { %1858 = vrot.lane.b32.xlu0 %v2798_v10, %s2740_s28  ;;  %1860 = vrot.lane.b32.xlu1 %v2805_v14, %s2740_s28 }
  0x70   : > { %1862 = vrot.lane.b32.xlu0 %v2807_v15, %s2740_s28  ;;  %1864 = vrot.lane.b32.xlu1 %v2814_v17, %s2740_s28 }
  0x74   : > { %1962 = vrot.lane.b32.xlu0 %v2798_v10, %s2738_s26  ;;  %1964 = vrot.lane.b32.xlu1 %v2805_v14, %s2738_s26 }
  0x78   : > { %1966 = vrot.lane.b32.xlu0 %v2807_v15, %s2738_s26  ;;  %1968 = vrot.lane.b32.xlu1 %v2814_v17, %s2738_s26 }
  0x7c   : > { %2087 = vrot.lane.b32.xlu0 %v2798_v10, %s2742_s30  ;;  %2089 = vrot.lane.b32.xlu1 %v2805_v14, %s2742_s30 }
  0x80   : > { %2091 = vrot.lane.b32.xlu0 %v2807_v15, %s2742_s30  ;;  %2093 = vrot.lane.b32.xlu1 %v2814_v17, %s2742_s30  ;;  %s245_s30 = scalar_lea.vmem %s3180_s5, %s2789_s20 }
  0x84   : > { %2215 = vrot.lane.b32.xlu0 %v2798_v10, %s2743_s6  ;;  %2217 = vrot.lane.b32.xlu1 %v2805_v14, %s2743_s6 }
  0x86   : > { %v272_v18 = vpop.permute.xlu0 %271  ;;  %v276_v19 = vpop.permute.xlu1 %275 }
  0x88   : > { %2219 = vrot.lane.b32.xlu0 %v2807_v15, %s2743_s6  ;;  %2221 = vrot.lane.b32.xlu1 %v2814_v17, %s2743_s6  ;;  %v2502_v17 = vld [vmem:[%s3176_s1 + $0x10] sm:$0xf] }
  0x8a   : > { %v274_v20 = vpop.permute.xlu0 %273  ;;  %v278_v24 = vpop.permute.xlu1 %277 }
  0x8b   : > { %v281_v22 = vsel %vm279_vm1, %v274_v20, %v276_v19  ;;  %v280_v23 = vsel %vm279_vm1, %v272_v18, %v274_v20  ;;  %v282_v26 = vsel %vm279_vm1, %v276_v19, %v278_v24 }
  0x8c   : > { %2486 = vmatprep.subr.msk.bf16.mxu0 %vm287_vm2, %v281_v22  ;;  %v289_v25 = vsel %vm287_vm2, %v280_v23, 0  ;;  %v295_v28 = vsel %vm287_vm2, %v282_v26, 0 }
  0x8d   : > { %312 = vmatpush1.bf16.msra.mxu0 %v289_v25  ;;  %2606 = vmatpush3.bf16.msra.mxu1 %v295_v28 }
  0x8e   : > { %2489 = vmatprep.subr.msk.bf16.mxu0 %vm287_vm2, %v394_v21  ;;  %v510_v29 = vpop.permute.xlu0 %509  ;;  %v512_v31 = vpop.permute.xlu1 %511  ;;  %2611 = vmatprep.subr.bf16.mxu1 %v2733_v5 }
  0x8f   : > { %v518_v34 = vsel %vm517_vm4, %v510_v29, %v512_v31 }
  0x90   : > { %2487 = vmatmul.mubr.msk.bf16.vlgmr.msra.gmra.mxu0 %vm283_vm3, %v2485_v27  ;;  %2608 = vmatmul.mubr.msk.bf16.vlgmr.msra.gmra.mxu1 %vm283_vm3, %v2485_v27  ;;  %v525_v39 = vsel %vm287_vm2, %v518_v34, 0  ;;  %v2510_v27 = vld [vmem:[%s3176_s1 + $0x18] sm:$0xf] }
  0x91   : > { %422 = vmatpush1.bf16.msra.mxu0 %v399_v30  ;;  %439 = vmatprep.mubr.bf16.mxu0 %v2734_v6 }
  0x92   : > { %v514_v33 = vpop.permute.xlu0 %513  ;;  %2612 = vmatpush3.bf16.msra.mxu1 %v405_v32  ;;  %2613 = vmatprep.mubr.msk.bf16.mxu1 %vm2735_vm0, %v2733_v5  ;;  %v516_v36 = vpop.permute.xlu1 %515 }
  0x93   : > { %v519_v35 = vsel %vm517_vm4, %v512_v31, %v514_v33  ;;  %2617 = vmatprep.subr.bf16.mxu1 %v2733_v5  ;;  %v520_v37 = vsel %vm517_vm4, %v514_v33, %v516_v36 }
  0x94   : > { %2493 = vmatprep.subr.msk.bf16.mxu0 %vm287_vm2, %v519_v35  ;;  %v531_v41 = vsel %vm287_vm2, %v520_v37, 0  ;;  %v2514_v37 = vld [vmem:[%s3176_s1 + $0x1c] sm:$0xf] }
  0x96   : > { %v639_v40 = vpop.permute.xlu0 %638  ;;  %v641_v42 = vpop.permute.xlu1 %640 }
  0x97   : > { %v647_v44 = vsel %vm646_vm5, %v639_v40, %v641_v42 }
  0x98   : > { %2490 = vmatmul.mubr.msk.bf16.vlgmr.msra.gmra.mxu0 %vm283_vm3, %v249_v38  ;;  %2614 = vmatmul.mubr.msk.bf16.vlgmr.msra.gmra.mxu1 %vm283_vm3, %v249_v38  ;;  %v654_v49 = vsel %vm287_vm2, %v647_v44, 0 }
  0x99   : > { %548 = vmatpush1.bf16.msra.mxu0 %v525_v39  ;;  %565 = vmatprep.mubr.bf16.mxu0 %v2734_v6 }
  0x9a   : > { %v643_v43 = vpop.permute.xlu0 %642  ;;  %2618 = vmatpush3.bf16.msra.mxu1 %v531_v41  ;;  %2619 = vmatprep.mubr.msk.bf16.mxu1 %vm2735_vm0, %v2733_v5  ;;  %v645_v46 = vpop.permute.xlu1 %644 }
  0x9b   : > { %v648_v45 = vsel %vm646_vm5, %v641_v42, %v643_v43  ;;  %2623 = vmatprep.subr.bf16.mxu1 %v2733_v5  ;;  %v649_v47 = vsel %vm646_vm5, %v643_v43, %v645_v46 }
  0x9c   : > { %2497 = vmatprep.subr.msk.bf16.mxu0 %vm287_vm2, %v648_v45  ;;  %v660_v51 = vsel %vm287_vm2, %v649_v47, 0  ;;  %v2523_v47 = vld [vmem:[%s3176_s1 + $0x24] sm:$0xf] }
  0x9e   : > { %v817_v50 = vpop.permute.xlu0 %816  ;;  %v819_v52 = vpop.permute.xlu1 %818 }
  0x9f   : > { %v825_v54 = vsel %vm824_vm6, %v817_v50, %v819_v52 }
  0xa0   : > { %2494 = vmatmul.mubr.msk.bf16.vlgmr.msra.gmra.mxu0 %vm283_vm3, %v2492_v48  ;;  %2620 = vmatmul.mubr.msk.bf16.vlgmr.msra.gmra.mxu1 %vm283_vm3, %v2492_v48  ;;  %v832_v59 = vsel %vm287_vm2, %v825_v54, 0 }
  0xa1   : > { %677 = vmatpush1.bf16.msra.mxu0 %v654_v49  ;;  %694 = vmatprep.mubr.bf16.mxu0 %v2734_v6 }
  0xa2   : > { %v821_v53 = vpop.permute.xlu0 %820  ;;  %2624 = vmatpush3.bf16.msra.mxu1 %v660_v51  ;;  %2625 = vmatprep.mubr.msk.bf16.mxu1 %vm2735_vm0, %v2733_v5  ;;  %v823_v56 = vpop.permute.xlu1 %822 }
  0xa3   : > { %v826_v55 = vsel %vm824_vm6, %v819_v52, %v821_v53  ;;  %2629 = vmatprep.subr.bf16.mxu1 %v2733_v5  ;;  %v827_v57 = vsel %vm824_vm6, %v821_v53, %v823_v56 }
  0xa4   : > { %2504 = vmatprep.subr.msk.bf16.mxu0 %vm287_vm2, %v826_v55  ;;  %v838_v61 = vsel %vm287_vm2, %v827_v57, 0  ;;  %v2522_v57 = vld [vmem:[%s3176_s1 + $0x20] sm:$0xf] }
  0xa6   : > { %v922_v60 = vpop.permute.xlu0 %921  ;;  %v924_v62 = vpop.permute.xlu1 %923 }
  0xa7   : > { %v929_v0 = vsel %vm279_vm1, %v922_v60, %v924_v62 }
  0xa8   : > { %2498 = vmatmul.mubr.msk.bf16.vlgmr.msra.gmra.mxu0 %vm283_vm3, %v2496_v58  ;;  %2626 = vmatmul.mubr.msk.bf16.vlgmr.msra.gmra.mxu1 %vm283_vm3, %v2496_v58  ;;  %v936_v8 = vsel %vm287_vm2, %v929_v0, 0 }
  0xa9   : > { %855 = vmatpush1.bf16.msra.mxu0 %v832_v59  ;;  %872 = vmatprep.mubr.bf16.mxu0 %v2734_v6 }
  0xaa   : > { %v926_v63 = vpop.permute.xlu0 %925  ;;  %2630 = vmatpush3.bf16.msra.mxu1 %v838_v61  ;;  %2631 = vmatprep.mubr.msk.bf16.mxu1 %vm2735_vm0, %v2733_v5  ;;  %v928_v2 = vpop.permute.xlu1 %927 }
  0xab   : > { %v930_v1 = vsel %vm279_vm1, %v924_v62, %v926_v63  ;;  %2635 = vmatprep.subr.bf16.mxu1 %v2733_v5  ;;  %v931_v4 = vsel %vm279_vm1, %v926_v63, %v928_v2 }
  0xac   : > { %2507 = vmatprep.subr.msk.bf16.mxu0 %vm287_vm2, %v930_v1  ;;  %v942_v10 = vsel %vm287_vm2, %v931_v4, 0  ;;  %v2530_v4 = vld [vmem:[%s3176_s1 + $0x28] sm:$0xf] }
  0xae   : > { %v1047_v9 = vpop.permute.xlu0 %1046  ;;  %v1049_v11 = vpop.permute.xlu1 %1048 }
  0xaf   : > { %v1054_v13 = vsel %vm646_vm5, %v1047_v9, %v1049_v11 }
  0xb0   : > { %2505 = vmatmul.mubr.msk.bf16.vlgmr.msra.gmra.mxu0 %vm283_vm3, %v2503_v7  ;;  %2632 = vmatmul.mubr.msk.bf16.vlgmr.msra.gmra.mxu1 %vm283_vm3, %v2503_v7  ;;  %v1061_v18 = vsel %vm287_vm2, %v1054_v13, 0 }
  0xb1   : > { %959 = vmatpush1.bf16.msra.mxu0 %v936_v8  ;;  %976 = vmatprep.mubr.bf16.mxu0 %v2734_v6 }
  0xb2   : > { %v1051_v12 = vpop.permute.xlu0 %1050  ;;  %2636 = vmatpush3.bf16.msra.mxu1 %v942_v10  ;;  %2637 = vmatprep.mubr.msk.bf16.mxu1 %vm2735_vm0, %v2733_v5  ;;  %v1053_v15 = vpop.permute.xlu1 %1052 }
  0xb3   : > { %v1055_v14 = vsel %vm646_vm5, %v1049_v11, %v1051_v12  ;;  %2641 = vmatprep.subr.bf16.mxu1 %v2733_v5  ;;  %v1056_v16 = vsel %vm646_vm5, %v1051_v12, %v1053_v15 }
  0xb4   : > { %2511 = vmatprep.subr.msk.bf16.mxu0 %vm287_vm2, %v1055_v14  ;;  %v1067_v20 = vsel %vm287_vm2, %v1056_v16, 0  ;;  %v2534_v16 = vld [vmem:[%s3176_s1 + $0x2c] sm:$0xf] }
  0xb6   : > { %v1175_v19 = vpop.permute.xlu0 %1174  ;;  %v1177_v21 = vpop.permute.xlu1 %1176 }
  0xb7   : > { %v1183_v23 = vsel %vm1182_vm7, %v1175_v19, %v1177_v21 }
  0xb8   : > { %2508 = vmatmul.mubr.msk.bf16.vlgmr.msra.gmra.mxu0 %vm283_vm3, %v2502_v17  ;;  %2638 = vmatmul.mubr.msk.bf16.vlgmr.msra.gmra.mxu1 %vm283_vm3, %v2502_v17  ;;  %v1190_v28 = vsel %vm287_vm2, %v1183_v23, 0 }
  0xb9   : > { %1084 = vmatpush1.bf16.msra.mxu0 %v1061_v18  ;;  %1101 = vmatprep.mubr.bf16.mxu0 %v2734_v6 }
  0xba   : > { %v1179_v22 = vpop.permute.xlu0 %1178  ;;  %2642 = vmatpush3.bf16.msra.mxu1 %v1067_v20  ;;  %2643 = vmatprep.mubr.msk.bf16.mxu1 %vm2735_vm0, %v2733_v5  ;;  %v1181_v25 = vpop.permute.xlu1 %1180 }
  0xbb   : > { %v1184_v24 = vsel %vm1182_vm7, %v1177_v21, %v1179_v22  ;;  %2647 = vmatprep.subr.bf16.mxu1 %v2733_v5  ;;  %v1185_v26 = vsel %vm1182_vm7, %v1179_v22, %v1181_v25 }
  0xbc   : > { %2515 = vmatprep.subr.msk.bf16.mxu0 %vm287_vm2, %v1184_v24  ;;  %v1196_v30 = vsel %vm287_vm2, %v1185_v26, 0  ;;  %v2543_v26 = vld [vmem:[%s3176_s1 + $0x34] sm:$0xf] }
  0xbe   : > { %v1338_v29 = vpop.permute.xlu0 %1337  ;;  %v1340_v31 = vpop.permute.xlu1 %1339 }
  0xbf   : > { %v1345_v33 = vsel %vm646_vm5, %v1338_v29, %v1340_v31 }
  0xc0   : > { %2512 = vmatmul.mubr.msk.bf16.vlgmr.msra.gmra.mxu0 %vm283_vm3, %v2510_v27  ;;  %2644 = vmatmul.mubr.msk.bf16.vlgmr.msra.gmra.mxu1 %vm283_vm3, %v2510_v27  ;;  %v1352_v38 = vsel %vm287_vm2, %v1345_v33, 0 }
  0xc1   : > { %1213 = vmatpush1.bf16.msra.mxu0 %v1190_v28  ;;  %1230 = vmatprep.mubr.bf16.mxu0 %v2734_v6 }
  0xc2   : > { %v1342_v32 = vpop.permute.xlu0 %1341  ;;  %2648 = vmatpush3.bf16.msra.mxu1 %v1196_v30  ;;  %2649 = vmatprep.mubr.msk.bf16.mxu1 %vm2735_vm0, %v2733_v5  ;;  %v1344_v35 = vpop.permute.xlu1 %1343 }
  0xc3   : > { %v1346_v34 = vsel %vm646_vm5, %v1340_v31, %v1342_v32  ;;  %2653 = vmatprep.subr.bf16.mxu1 %v2733_v5  ;;  %v1347_v36 = vsel %vm646_vm5, %v1342_v32, %v1344_v35 }
  0xc4   : > { %2524 = vmatprep.subr.msk.bf16.mxu0 %vm287_vm2, %v1346_v34  ;;  %v1358_v40 = vsel %vm287_vm2, %v1347_v36, 0  ;;  %v2542_v36 = vld [vmem:[%s3176_s1 + $0x30] sm:$0xf] }
  0xc6   : > { %v1442_v39 = vpop.permute.xlu0 %1441  ;;  %v1444_v41 = vpop.permute.xlu1 %1443 }
  0xc7   : > { %v1449_v43 = vsel %vm517_vm4, %v1442_v39, %v1444_v41 }
  0xc8   : > { %2516 = vmatmul.mubr.msk.bf16.vlgmr.msra.gmra.mxu0 %vm283_vm3, %v2514_v37  ;;  %2650 = vmatmul.mubr.msk.bf16.vlgmr.msra.gmra.mxu1 %vm283_vm3, %v2514_v37  ;;  %v1456_v48 = vsel %vm287_vm2, %v1449_v43, 0 }
  0xc9   : > { %1375 = vmatpush1.bf16.msra.mxu0 %v1352_v38  ;;  %1392 = vmatprep.mubr.bf16.mxu0 %v2734_v6 }
  0xca   : > { %v1446_v42 = vpop.permute.xlu0 %1445  ;;  %2654 = vmatpush3.bf16.msra.mxu1 %v1358_v40  ;;  %2655 = vmatprep.mubr.msk.bf16.mxu1 %vm2735_vm0, %v2733_v5  ;;  %v1448_v45 = vpop.permute.xlu1 %1447 }
  0xcb   : > { %v1450_v44 = vsel %vm517_vm4, %v1444_v41, %v1446_v42  ;;  %2659 = vmatprep.subr.bf16.mxu1 %v2733_v5  ;;  %v1451_v46 = vsel %vm517_vm4, %v1446_v42, %v1448_v45 }
  0xcc   : > { %2527 = vmatprep.subr.msk.bf16.mxu0 %vm287_vm2, %v1450_v44  ;;  %v1462_v50 = vsel %vm287_vm2, %v1451_v46, 0  ;;  %v2550_v46 = vld [vmem:[%s3176_s1 + $0x38] sm:$0xf] }
  0xce   : > { %v1567_v49 = vpop.permute.xlu0 %1566  ;;  %v1569_v51 = vpop.permute.xlu1 %1568 }
  0xcf   : > { %v1575_v53 = vsel %vm1574_vm8, %v1567_v49, %v1569_v51  ;;  %v2554_v49 = vld [vmem:[%s3176_s1 + $0x3c] sm:$0xf] }
  0xd0   : > { %2525 = vmatmul.mubr.msk.bf16.vlgmr.msra.gmra.mxu0 %vm283_vm3, %v2523_v47  ;;  %2656 = vmatmul.mubr.msk.bf16.vlgmr.msra.gmra.mxu1 %vm283_vm3, %v2523_v47  ;;  %v1582_v58 = vsel %vm287_vm2, %v1575_v53, 0 }
  0xd1   : > { %1479 = vmatpush1.bf16.msra.mxu0 %v1456_v48  ;;  %1496 = vmatprep.mubr.bf16.mxu0 %v2734_v6 }
  0xd2   : > { %v1571_v52 = vpop.permute.xlu0 %1570  ;;  %2660 = vmatpush3.bf16.msra.mxu1 %v1462_v50  ;;  %2661 = vmatprep.mubr.msk.bf16.mxu1 %vm2735_vm0, %v2733_v5  ;;  %v1573_v55 = vpop.permute.xlu1 %1572 }
  0xd3   : > { %v1576_v54 = vsel %vm1574_vm8, %v1569_v51, %v1571_v52  ;;  %2665 = vmatprep.subr.bf16.mxu1 %v2733_v5  ;;  %v1577_v56 = vsel %vm1574_vm8, %v1571_v52, %v1573_v55 }
  0xd4   : > { %2531 = vmatprep.subr.msk.bf16.mxu0 %vm287_vm2, %v1576_v54  ;;  %v1588_v60 = vsel %vm287_vm2, %v1577_v56, 0 }
  0xd6   : > { %v1696_v59 = vpop.permute.xlu0 %1695  ;;  %v1698_v61 = vpop.permute.xlu1 %1697 }
  0xd7   : > { %v1704_v63 = vsel %vm1703_vm9, %v1696_v59, %v1698_v61 }
  0xd8   : > { %2528 = vmatmul.mubr.msk.bf16.vlgmr.msra.gmra.mxu0 %vm283_vm3, %v2522_v57  ;;  %2662 = vmatmul.mubr.msk.bf16.vlgmr.msra.gmra.mxu1 %vm283_vm3, %v2522_v57  ;;  %v1711_v7 = vsel %vm287_vm2, %v1704_v63, 0 }
  0xd9   : > { %1605 = vmatpush1.bf16.msra.mxu0 %v1582_v58  ;;  %1622 = vmatprep.mubr.bf16.mxu0 %v2734_v6 }
  0xda   : > { %v1700_v62 = vpop.permute.xlu0 %1699  ;;  %2666 = vmatpush3.bf16.msra.mxu1 %v1588_v60  ;;  %2667 = vmatprep.mubr.msk.bf16.mxu1 %vm2735_vm0, %v2733_v5  ;;  %v1702_v1 = vpop.permute.xlu1 %1701 }
  0xdb   : > { %v1705_v0 = vsel %vm1703_vm9, %v1698_v61, %v1700_v62  ;;  %2671 = vmatprep.subr.bf16.mxu1 %v2733_v5  ;;  %v1706_v2 = vsel %vm1703_vm9, %v1700_v62, %v1702_v1 }
  0xdc   : > { %2535 = vmatprep.subr.msk.bf16.mxu0 %vm287_vm2, %v1705_v0  ;;  %v1717_v9 = vsel %vm287_vm2, %v1706_v2, 0 }
  0xde   : > { %v1859_v8 = vpop.permute.xlu0 %1858  ;;  %v1861_v10 = vpop.permute.xlu1 %1860 }
  0xdf   : > { %v1866_v12 = vsel %vm1182_vm7, %v1859_v8, %v1861_v10 }
  0xe0   : > { %2532 = vmatmul.mubr.msk.bf16.vlgmr.msra.gmra.mxu0 %vm283_vm3, %v2530_v4  ;;  %2668 = vmatmul.mubr.msk.bf16.vlgmr.msra.gmra.mxu1 %vm283_vm3, %v2530_v4  ;;  %v1873_v17 = vsel %vm287_vm2, %v1866_v12, 0  ;;  %v764_v4 = vsub.s32 0, %v2784_v3 }
  0xe1   : > { %1734 = vmatpush1.bf16.msra.mxu0 %v1711_v7  ;;  %1751 = vmatprep.mubr.bf16.mxu0 %v2734_v6 }
  0xe2   : > { %v1863_v11 = vpop.permute.xlu0 %1862  ;;  %2672 = vmatpush3.bf16.msra.mxu1 %v1717_v9  ;;  %2673 = vmatprep.mubr.msk.bf16.mxu1 %vm2735_vm0, %v2733_v5  ;;  %v1865_v14 = vpop.permute.xlu1 %1864  ;;  %v247_v9 = vld [vmem:[%s3177_s2] sm:$0x7] }
  0xe3   : > { %v1867_v13 = vsel %vm1182_vm7, %v1861_v10, %v1863_v11  ;;  %2677 = vmatprep.subr.bf16.mxu1 %v2733_v5  ;;  %v1868_v15 = vsel %vm1182_vm7, %v1863_v11, %v1865_v14  ;;  %v768_v11 = vsub.s32 1, %v2784_v3  ;;  %v772_v14 = vsub.s32 2, %v2784_v3 }
  0xe4   : > { %2544 = vmatprep.subr.msk.bf16.mxu0 %vm287_vm2, %v1867_v13  ;;  %v1879_v19 = vsel %vm287_vm2, %v1868_v15, 0 }
  0xe6   : > { %v1963_v18 = vpop.permute.xlu0 %1962  ;;  %v1965_v20 = vpop.permute.xlu1 %1964 }
  0xe7   : > { %v1970_v22 = vsel %vm646_vm5, %v1963_v18, %v1965_v20  ;;  %v3132_v18 = vrot.slane %v247_v9, %v764_v4 }
  0xe8   : > { %2536 = vmatmul.mubr.msk.bf16.vlgmr.msra.gmra.mxu0 %vm283_vm3, %v2534_v16  ;;  %2674 = vmatmul.mubr.msk.bf16.vlgmr.msra.gmra.mxu1 %vm283_vm3, %v2534_v16  ;;  %v1977_v27 = vsel %vm287_vm2, %v1970_v22, 0 }
  0xe9   : > { %1896 = vmatpush1.bf16.msra.mxu0 %v1873_v17  ;;  %1913 = vmatprep.mubr.bf16.mxu0 %v2734_v6 }
  0xea   : > { %v1967_v21 = vpop.permute.xlu0 %1966  ;;  %2678 = vmatpush3.bf16.msra.mxu1 %v1879_v19  ;;  %2679 = vmatprep.mubr.msk.bf16.mxu1 %vm2735_vm0, %v2733_v5  ;;  %v1969_v24 = vpop.permute.xlu1 %1968 }
  0xeb   : > { %v1971_v23 = vsel %vm646_vm5, %v1965_v20, %v1967_v21  ;;  %2683 = vmatprep.subr.bf16.mxu1 %v2733_v5  ;;  %v1972_v25 = vsel %vm646_vm5, %v1967_v21, %v1969_v24  ;;  %v3135_v24 = vrot.slane %v247_v9, %v768_v11 }
  0xec   : > { %2547 = vmatprep.subr.msk.bf16.mxu0 %vm287_vm2, %v1971_v23  ;;  %v1983_v29 = vsel %vm287_vm2, %v1972_v25, 0 }
  0xee   : > { %v2088_v28 = vpop.permute.xlu0 %2087  ;;  %v2090_v30 = vpop.permute.xlu1 %2089 }
  0xef   : > { %v2095_v32 = vsel %vm1703_vm9, %v2088_v28, %v2090_v30 }
  0xf0   : > { %2545 = vmatmul.mubr.msk.bf16.vlgmr.msra.gmra.mxu0 %vm283_vm3, %v2543_v26  ;;  %2680 = vmatmul.mubr.msk.bf16.vlgmr.msra.gmra.mxu1 %vm283_vm3, %v2543_v26  ;;  %v2102_v37 = vsel %vm287_vm2, %v2095_v32, 0 }
  0xf1   : > { %2000 = vmatpush1.bf16.msra.mxu0 %v1977_v27  ;;  %2017 = vmatprep.mubr.bf16.mxu0 %v2734_v6  ;;  %v3137_v27 = vrot.slane %v247_v9, %v772_v14 }
  0xf2   : > { %v2092_v31 = vpop.permute.xlu0 %2091  ;;  %2684 = vmatpush3.bf16.msra.mxu1 %v1983_v29  ;;  %2685 = vmatprep.mubr.msk.bf16.mxu1 %vm2735_vm0, %v2733_v5  ;;  %v2094_v34 = vpop.permute.xlu1 %2093 }
  0xf3   : > { %v2096_v33 = vsel %vm1703_vm9, %v2090_v30, %v2092_v31  ;;  %2689 = vmatprep.subr.bf16.mxu1 %v2733_v5  ;;  %v2097_v35 = vsel %vm1703_vm9, %v2092_v31, %v2094_v34 }
  0xf4   : > { %2551 = vmatprep.subr.msk.bf16.mxu0 %vm287_vm2, %v2096_v33  ;;  %v2108_v39 = vsel %vm287_vm2, %v2097_v35, 0 }
  0xf6   : > { %v2216_v38 = vpop.permute.xlu0 %2215  ;;  %v2218_v40 = vpop.permute.xlu1 %2217 }
  0xf7   : > { %v2224_v42 = vsel %vm2223_vm10, %v2216_v38, %v2218_v40 }
  0xf8   : > { %2548 = vmatmul.mubr.msk.bf16.vlgmr.msra.gmra.mxu0 %vm283_vm3, %v2542_v36  ;;  %2686 = vmatmul.mubr.msk.bf16.vlgmr.msra.gmra.mxu1 %vm283_vm3, %v2542_v36  ;;  %v2231_v47 = vsel %vm287_vm2, %v2224_v42, 0 }
  0xf9   : > { %2125 = vmatpush1.bf16.msra.mxu0 %v2102_v37  ;;  %2142 = vmatprep.mubr.bf16.mxu0 %v2734_v6 }
  0xfa   : > { %v2220_v41 = vpop.permute.xlu0 %2219  ;;  %2690 = vmatpush3.bf16.msra.mxu1 %v2108_v39  ;;  %2691 = vmatprep.mubr.msk.bf16.mxu1 %vm2735_vm0, %v2733_v5  ;;  %v2222_v44 = vpop.permute.xlu1 %2221 }
  0xfb   : > { %v2225_v43 = vsel %vm2223_vm10, %v2218_v40, %v2220_v41  ;;  %2695 = vmatprep.subr.bf16.mxu1 %v2733_v5  ;;  %v2226_v45 = vsel %vm2223_vm10, %v2220_v41, %v2222_v44 }
  0xfc   : > { %2555 = vmatprep.subr.msk.bf16.mxu0 %vm287_vm2, %v2225_v43  ;;  %v2237_v48 = vsel %vm287_vm2, %v2226_v45, 0 }
 0x100   : > { %2552 = vmatmul.mubr.msk.bf16.vlgmr.msra.gmra.mxu0 %vm283_vm3, %v2550_v46  ;;  %2692 = vmatmul.mubr.msk.bf16.vlgmr.msra.gmra.mxu1 %vm283_vm3, %v2550_v46 }
 0x101   : > { %2254 = vmatpush1.bf16.msra.mxu0 %v2231_v47  ;;  %2271 = vmatprep.mubr.bf16.mxu0 %v2734_v6 }
 0x102   : > { %2696 = vmatpush3.bf16.msra.mxu1 %v2237_v48  ;;  %2697 = vmatprep.mubr.msk.bf16.mxu1 %vm2735_vm0, %v2733_v5 }
 0x108   : > { %2556 = vmatmul.mubr.msk.bf16.vlgmr.msra.gmra.mxu0 %vm283_vm3, %v2554_v49  ;;  %2698 = vmatmul.mubr.msk.bf16.vlgmr.msra.gmra.mxu1 %vm283_vm3, %v2554_v49 }
 0x150   : > { %v331_v50 = vpop.f32.mrf.mxu0  ;;  %v372_v52 = vpop.f32.mrf.mxu1 }
 0x152   : > { %v333_v51 = vpop.f32.mrf.mxu0  ;;  %v2609_v54 = vpop.f32.mrf.mxu1 }
 0x154   : > { %v335_v53 = vpop.f32.mrf.mxu0  ;;  %v375_v55 = vpop.f32.mrf.mxu1 }
 0x156   : > { %v336_v6 = vpop.f32.mrf.mxu0  ;;  %v2610_v56 = vpop.f32.mrf.mxu1 }
 0x158   : > { %v441_v57 = vpop.f32.mrf.mxu0  ;;  %v482_v59 = vpop.f32.mrf.mxu1 }
 0x159   : > { %v442_v10 = vadd.f32 %v441_v57, %v331_v50  ;;  %v483_v16 = vadd.f32 %v482_v59, %v372_v52 }
 0x15a   : > { %v443_v58 = vpop.f32.mrf.mxu0  ;;  %v2615_v60 = vpop.f32.mrf.mxu1 }
 0x15b   : > { %v444_v15 = vadd.f32 %v443_v58, %v333_v51 }
 0x15c   : > { %v445_v5 = vpop.f32.mrf.mxu0  ;;  %v485_v62 = vpop.f32.mrf.mxu1 }
 0x15e   : > { %v446_v61 = vpop.f32.mrf.mxu0  ;;  %v2616_v63 = vpop.f32.mrf.mxu1 }
 0x160   : > { %v567_v0 = vpop.f32.mrf.mxu0  ;;  %v608_v2 = vpop.f32.mrf.mxu1 }
 0x161   : > { %v614_v17 = vadd.f32 %v567_v0, %v442_v10  ;;  %v616_v22 = vadd.f32 %v608_v2, %v483_v16 }
 0x162   : > { %v569_v1 = vpop.f32.mrf.mxu0  ;;  %v2621_v8 = vpop.f32.mrf.mxu1 }
 0x163   : > { %v615_v21 = vadd.f32 %v569_v1, %v444_v15 }
 0x164   : > { %v571_v7 = vpop.f32.mrf.mxu0  ;;  %v611_v13 = vpop.f32.mrf.mxu1 }
 0x166   : > { %v572_v12 = vpop.f32.mrf.mxu0  ;;  %v2622_v19 = vpop.f32.mrf.mxu1 }
 0x168   : > { %v696_v20 = vpop.f32.mrf.mxu0  ;;  %v737_v26 = vpop.f32.mrf.mxu1 }
 0x169   : > { %v743_v23 = vadd.f32 %v696_v20, %v614_v17  ;;  %v745_v29 = vadd.f32 %v737_v26, %v616_v22 }
 0x16a   : > { %v698_v25 = vpop.f32.mrf.mxu0  ;;  %v2627_v31 = vpop.f32.mrf.mxu1 }
 0x16b   : > { %v777_v28 = vmul.f32 %v3132_v18, %v743_v23  ;;  %v744_v3 = vadd.f32 %v698_v25, %v615_v21  ;;  %v2566_v34 = vpack.c.bf16 %v745_v29, %v745_v29  ;;  %v779_v37 = vmul.f32 %v3137_v27, %v745_v29 }
 0x16c   : > { %v700_v30 = vpop.f32.mrf.mxu0  ;;  %v740_v36 = vpop.f32.mrf.mxu1 }
 0x16d   : > { %v2565_v32 = vpack.c.bf16 %v744_v3, %v743_v23  ;;  %v778_v33 = vmul.f32 %v3135_v24, %v744_v3  ;;  %v785_v38 = vmul.f32 %v777_v28, %v743_v23  ;;  %760 = vst [vmem:[%s3143_s25 + $0x8] sm:$0xf] %v2566_v34  ;;  %v787_v44 = vmul.f32 %v779_v37, %v745_v29 }
 0x16e   : > { %v701_v35 = vpop.f32.mrf.mxu0  ;;  %v2628_v41 = vpop.f32.mrf.mxu1 }
 0x16f   : > { %759 = vst [vmem:[%s3143_s25] sm:$0xff] %v2565_v32  ;;  %v786_v39 = vmul.f32 %v778_v33, %v744_v3  ;;  %v780_v40 = vadd.f32 %v778_v33, %v777_v28 }
 0x170   : > { %v874_v42 = vpop.f32.mrf.mxu0  ;;  %v915_v47 = vpop.f32.mrf.mxu1 }
 0x171   : > { %v781_v43 = vadd.f32 %v780_v40, %v779_v37  ;;  %v788_v45 = vadd.f32 %v786_v39, %v785_v38 }
 0x172   : > { %v876_v46 = vpop.f32.mrf.mxu0  ;;  %v2633_v50 = vpop.f32.mrf.mxu1 }
 0x173   : > { %782 = vadd.xlane.f32.xlu0 %v781_v43  ;;  %v789_v48 = vadd.f32 %v788_v45, %v787_v44 }
 0x174   : > { %v878_v49 = vpop.f32.mrf.mxu0  ;;  %v918_v52 = vpop.f32.mrf.mxu1 }
 0x175   : > { %790 = vadd.xlane.f32.xlu1 %v789_v48 }
 0x176   : > { %v879_v51 = vpop.f32.mrf.mxu0  ;;  %v2634_v53 = vpop.f32.mrf.mxu1 }
 0x178   : > { %v978_v54 = vpop.f32.mrf.mxu0  ;;  %v1019_v55 = vpop.f32.mrf.mxu1 }
 0x179   : > { %v979_v1 = vadd.f32 %v978_v54, %v874_v42  ;;  %v1020_v8 = vadd.f32 %v1019_v55, %v915_v47 }
 0x17a   : > { %v980_v6 = vpop.f32.mrf.mxu0  ;;  %v2639_v57 = vpop.f32.mrf.mxu1 }
 0x17b   : > { %v981_v7 = vadd.f32 %v980_v6, %v876_v46 }
 0x17c   : > { %v982_v56 = vpop.f32.mrf.mxu0  ;;  %v1022_v59 = vpop.f32.mrf.mxu1 }
 0x17e   : > { %v983_v58 = vpop.f32.mrf.mxu0  ;;  %v2640_v5 = vpop.f32.mrf.mxu1 }
 0x180   : > { %v1103_v60 = vpop.f32.mrf.mxu0  ;;  %v1144_v62 = vpop.f32.mrf.mxu1 }
 0x181   : > { %v1150_v9 = vadd.f32 %v1103_v60, %v979_v1  ;;  %v1152_v13 = vadd.f32 %v1144_v62, %v1020_v8 }
 0x182   : > { %v1105_v61 = vpop.f32.mrf.mxu0  ;;  %v2645_v0 = vpop.f32.mrf.mxu1 }
 0x183   : > { %v1151_v12 = vadd.f32 %v1105_v61, %v981_v7 }
 0x184   : > { %v1107_v63 = vpop.f32.mrf.mxu0  ;;  %v1147_v4 = vpop.f32.mrf.mxu1 }
 0x186   : > { %v1108_v2 = vpop.f32.mrf.mxu0  ;;  %v2646_v10 = vpop.f32.mrf.mxu1 }
 0x188   : > { %v1232_v11 = vpop.f32.mrf.mxu0  ;;  %v1273_v16 = vpop.f32.mrf.mxu1 }
 0x189   : > { %v1279_v14 = vadd.f32 %v1232_v11, %v1150_v9  ;;  %v1281_v20 = vadd.f32 %v1273_v16, %v1152_v13 }
 0x18a   : > { %v1234_v15 = vpop.f32.mrf.mxu0  ;;  %v2651_v22 = vpop.f32.mrf.mxu1 }
 0x18b   : > { %v1298_v17 = vmul.f32 %v1279_v14, %v3132_v18  ;;  %v1280_v19 = vadd.f32 %v1234_v15, %v1151_v12  ;;  %v2568_v26 = vpack.c.bf16 %v1281_v20, %v1281_v20  ;;  %v1300_v31 = vmul.f32 %v1281_v20, %v3137_v27 }
 0x18c   : > { %v1236_v21 = vpop.f32.mrf.mxu0  ;;  %v1276_v3 = vpop.f32.mrf.mxu1 }
 0x18d   : > { %v2567_v23 = vpack.c.bf16 %v1280_v19, %v1279_v14  ;;  %v1299_v25 = vmul.f32 %v1280_v19, %v3135_v24  ;;  %v1306_v29 = vmul.f32 %v1298_v17, %v1279_v14  ;;  %2521 = vst [vmem:[%s3143_s25 + $0x14] sm:$0xf] %v2568_v26  ;;  %v1308_v39 = vmul.f32 %v1300_v31, %v1281_v20 }
 0x18e   : > { %v1237_v28 = vpop.f32.mrf.mxu0  ;;  %v2652_v33 = vpop.f32.mrf.mxu1 }
 0x18f   : > { %2520 = vst [vmem:[%s3143_s25 + $0xc] sm:$0xff] %v2567_v23  ;;  %v1307_v30 = vmul.f32 %v1299_v25, %v1280_v19  ;;  %v1301_v32 = vadd.f32 %v1299_v25, %v1298_v17 }
 0x190   : > { %v1394_v34 = vpop.f32.mrf.mxu0  ;;  %v1435_v38 = vpop.f32.mrf.mxu1 }
 0x191   : > { %v1302_v35 = vadd.f32 %v1301_v32, %v1300_v31  ;;  %v1309_v36 = vadd.f32 %v1307_v30, %v1306_v29 }
 0x192   : > { %v1396_v37 = vpop.f32.mrf.mxu0  ;;  %v2657_v41 = vpop.f32.mrf.mxu1 }
 0x193   : > { %1303 = vadd.xlane.f32.xlu0 %v1302_v35  ;;  %v1310_v42 = vadd.f32 %v1309_v36, %v1308_v39 }
 0x194   : > { %v1398_v40 = vpop.f32.mrf.mxu0  ;;  %v1438_v44 = vpop.f32.mrf.mxu1 }
 0x196   : > { %v1399_v43 = vpop.f32.mrf.mxu0  ;;  %v2658_v45 = vpop.f32.mrf.mxu1 }
 0x197   : > { %1311 = vadd.xlane.f32.xlu0 %v1310_v42 }
 0x198   : > { %v1498_v46 = vpop.f32.mrf.mxu0  ;;  %v1539_v48 = vpop.f32.mrf.mxu1 }
 0x199   : > { %v1499_v58 = vadd.f32 %v1498_v46, %v1394_v34  ;;  %v1540_v61 = vadd.f32 %v1539_v48, %v1435_v38 }
 0x19a   : > { %v1500_v47 = vpop.f32.mrf.mxu0  ;;  %v2663_v50 = vpop.f32.mrf.mxu1 }
 0x19b   : > { %v1501_v60 = vadd.f32 %v1500_v47, %v1396_v37 }
 0x19c   : > { %v1502_v49 = vpop.f32.mrf.mxu0  ;;  %v1542_v52 = vpop.f32.mrf.mxu1 }
 0x19e   : > { %v1503_v51 = vpop.f32.mrf.mxu0  ;;  %v2664_v53 = vpop.f32.mrf.mxu1 }
 0x1a0   : > { %v1624_v54 = vpop.f32.mrf.mxu0  ;;  %v1665_v55 = vpop.f32.mrf.mxu1 }
 0x1a1   : > { %v1671_v62 = vadd.f32 %v1624_v54, %v1499_v58  ;;  %v1673_v2 = vadd.f32 %v1665_v55, %v1540_v61 }
 0x1a2   : > { %v1626_v6 = vpop.f32.mrf.mxu0  ;;  %v2669_v57 = vpop.f32.mrf.mxu1 }
 0x1a3   : > { %v1672_v1 = vadd.f32 %v1626_v6, %v1501_v60 }
 0x1a4   : > { %v1628_v56 = vpop.f32.mrf.mxu0  ;;  %v1668_v5 = vpop.f32.mrf.mxu1 }
 0x1a6   : > { %v1629_v59 = vpop.f32.mrf.mxu0  ;;  %v2670_v63 = vpop.f32.mrf.mxu1 }
 0x1a8   : > { %v1753_v0 = vpop.f32.mrf.mxu0  ;;  %v1794_v8 = vpop.f32.mrf.mxu1 }
 0x1a9   : > { %v1800_v4 = vadd.f32 %v1753_v0, %v1671_v62  ;;  %v1802_v11 = vadd.f32 %v1794_v8, %v1673_v2 }
 0x1aa   : > { %v1755_v7 = vpop.f32.mrf.mxu0  ;;  %v2675_v13 = vpop.f32.mrf.mxu1 }
 0x1ab   : > { %v1819_v9 = vmul.f32 %v1800_v4, %v3132_v18  ;;  %v1801_v10 = vadd.f32 %v1755_v7, %v1672_v1  ;;  %v2570_v16 = vpack.c.bf16 %v1802_v11, %v1802_v11  ;;  %v1821_v20 = vmul.f32 %v1802_v11, %v3137_v27 }
 0x1ac   : > { %v1757_v12 = vpop.f32.mrf.mxu0  ;;  %v1797_v19 = vpop.f32.mrf.mxu1 }
 0x1ad   : > { %v2569_v14 = vpack.c.bf16 %v1801_v10, %v1800_v4  ;;  %v1820_v15 = vmul.f32 %v1801_v10, %v3135_v24  ;;  %v1827_v21 = vmul.f32 %v1819_v9, %v1800_v4  ;;  %2541 = vst [vmem:[%s3143_s25 + $0x20] sm:$0xf] %v2570_v16  ;;  %v1829_v3 = vmul.f32 %v1821_v20, %v1802_v11 }
 0x1ae   : > { %v1758_v17 = vpop.f32.mrf.mxu0  ;;  %v2676_v25 = vpop.f32.mrf.mxu1 }
 0x1af   : > { %2540 = vst [vmem:[%s3143_s25 + $0x18] sm:$0xff] %v2569_v14  ;;  %v1828_v22 = vmul.f32 %v1820_v15, %v1801_v10  ;;  %v1822_v23 = vadd.f32 %v1820_v15, %v1819_v9 }
 0x1b0   : > { %v1915_v26 = vpop.f32.mrf.mxu0  ;;  %v1956_v31 = vpop.f32.mrf.mxu1 }
 0x1b1   : > { %v1823_v28 = vadd.f32 %v1822_v23, %v1821_v20  ;;  %v1830_v29 = vadd.f32 %v1828_v22, %v1827_v21 }
 0x1b2   : > { %v1917_v30 = vpop.f32.mrf.mxu0  ;;  %v2681_v34 = vpop.f32.mrf.mxu1 }
 0x1b3   : > { %1824 = vadd.xlane.f32.xlu1 %v1823_v28  ;;  %v1831_v32 = vadd.f32 %v1830_v29, %v1829_v3 }
 0x1b4   : > { %v1919_v33 = vpop.f32.mrf.mxu0  ;;  %v1959_v36 = vpop.f32.mrf.mxu1 }
 0x1b5   : > { %1832 = vadd.xlane.f32.xlu0 %v1831_v32 }
 0x1b6   : > { %v1920_v35 = vpop.f32.mrf.mxu0  ;;  %v2682_v37 = vpop.f32.mrf.mxu1 }
 0x1b8   : > { %v2019_v38 = vpop.f32.mrf.mxu0  ;;  %v2060_v40 = vpop.f32.mrf.mxu1 }
 0x1b9   : > { %v2020_v51 = vadd.f32 %v2019_v38, %v1915_v26  ;;  %v2061_v6 = vadd.f32 %v2060_v40, %v1956_v31 }
 0x1ba   : > { %v2021_v39 = vpop.f32.mrf.mxu0  ;;  %v2687_v42 = vpop.f32.mrf.mxu1 }
 0x1bb   : > { %v2022_v54 = vadd.f32 %v2021_v39, %v1917_v30 }
 0x1bc   : > { %v2023_v41 = vpop.f32.mrf.mxu0  ;;  %v2063_v44 = vpop.f32.mrf.mxu1 }
 0x1be   : > { %v2024_v43 = vpop.f32.mrf.mxu0  ;;  %v2688_v45 = vpop.f32.mrf.mxu1 }
 0x1c0   : > { %v2144_v46 = vpop.f32.mrf.mxu0  ;;  %v2185_v48 = vpop.f32.mrf.mxu1 }
 0x1c1   : > { %v2191_v55 = vadd.f32 %v2144_v46, %v2020_v51  ;;  %v2193_v59 = vadd.f32 %v2185_v48, %v2061_v6 }
 0x1c2   : > { %v2146_v47 = vpop.f32.mrf.mxu0  ;;  %v2693_v50 = vpop.f32.mrf.mxu1 }
 0x1c3   : > { %v2192_v58 = vadd.f32 %v2146_v47, %v2022_v54 }
 0x1c4   : > { %v2148_v49 = vpop.f32.mrf.mxu0  ;;  %v2188_v53 = vpop.f32.mrf.mxu1 }
 0x1c6   : > { %v2149_v52 = vpop.f32.mrf.mxu0  ;;  %v2694_v56 = vpop.f32.mrf.mxu1 }
 0x1c8   : > { %v2273_v57 = vpop.f32.mrf.mxu0  ;;  %v2314_v61 = vpop.f32.mrf.mxu1 }
 0x1c9   : > { %v2320_v5 = vadd.f32 %v2273_v57, %v2191_v55  ;;  %v2322_v0 = vadd.f32 %v2314_v61, %v2193_v59 }
 0x1ca   : > { %v2275_v60 = vpop.f32.mrf.mxu0  ;;  %v2699_v2 = vpop.f32.mrf.mxu1 }
 0x1cb   : > { %v2339_v62 = vmul.f32 %v2320_v5, %v3132_v18  ;;  %v2321_v63 = vadd.f32 %v2275_v60, %v2192_v58  ;;  %v2572_v8 = vpack.c.bf16 %v2322_v0, %v2322_v0  ;;  %v2341_v11 = vmul.f32 %v2322_v0, %v3137_v27 }
 0x1cc   : > { %v2277_v1 = vpop.f32.mrf.mxu0  ;;  %v2317_v10 = vpop.f32.mrf.mxu1 }
 0x1cd   : > { %v2571_v4 = vpack.c.bf16 %v2321_v63, %v2320_v5  ;;  %v2340_v7 = vmul.f32 %v2321_v63, %v3135_v24  ;;  %v2347_v12 = vmul.f32 %v2339_v62, %v2320_v5  ;;  %2561 = vst [vmem:[%s3143_s25 + $0x2c] sm:$0xf] %v2572_v8  ;;  %v2349_v16 = vmul.f32 %v2341_v11, %v2322_v0 }
 0x1ce   : > { %v2278_v9 = vpop.f32.mrf.mxu0  ;;  %v2700_v15 = vpop.f32.mrf.mxu1 }
 0x1cf   : > { %2560 = vst [vmem:[%s3143_s25 + $0x24] sm:$0xff] %v2571_v4  ;;  %v2348_v13 = vmul.f32 %v2340_v7, %v2321_v63  ;;  %v2342_v14 = vadd.f32 %v2340_v7, %v2339_v62 }
 0x1d1   : > { %v2343_v18 = vadd.f32 %v2342_v14, %v2341_v11  ;;  %v2350_v17 = vadd.f32 %v2348_v13, %v2347_v12 }
 0x1d3   : > { %2344 = vadd.xlane.f32.xlu1 %v2343_v18  ;;  %v2351_v19 = vadd.f32 %v2350_v17, %v2349_v16 }
 0x1d5   : > { %2352 = vadd.xlane.f32.xlu0 %v2351_v19 }
 0x1fc   : > { %v783_v24 = vpop.xlane.xlu0 %782 }
 0x1fe   : > { %v791_v21 = vpop.xlane.xlu1 %790 }
 0x21c   : > { %v1304_v20 = vpop.xlane.xlu0 %1303 }
 0x21d   : > { %v1305_v27 = vadd.f32 %v1304_v20, %v783_v24 }
 0x220   : > { %v1312_v22 = vpop.xlane.xlu0 %1311 }
 0x221   : > { %v1313_v26 = vadd.f32 %v1312_v22, %v791_v21 }
 0x23c   : > { %v1825_v23 = vpop.xlane.xlu1 %1824 }
 0x23d   : > { %v1826_v28 = vadd.f32 %v1825_v23, %v1305_v27 }
 0x23e   : > { %v1833_v25 = vpop.xlane.xlu0 %1832 }
 0x23f   : > { %v1834_v29 = vadd.f32 %v1833_v25, %v1313_v26 }
 0x25c   : > { %v2345_v3 = vpop.xlane.xlu1 %2344 }
 0x25d   : > { %v2346_v30 = vadd.f32 %v2345_v3, %v1826_v28 }
 0x25e   : > { %v2353_v31 = vpop.xlane.xlu0 %2352 }
 0x25f   : > { %2356 = vst.msk [vmem:[%s241_s27] sm:$0xff] %vm2355_vm11, %v2346_v30  ;;  %v2354_v32 = vadd.f32 %v2353_v31, %v1834_v29 }
 0x261   : > { %2357 = vst.msk [vmem:[%s245_s30] sm:$0xff] %vm2355_vm11, %v2354_v32 }
 0x262 PF: > { %s16_s18 = sadd.s32 1, %s2730_s18  }
 0x263   : > { %p13_p4 = scmp.ge.s32.totalorder %s16_s18, 4  }
 0x265   :  { %15 = sbr.rel (!%p13_p4) target bundleno = 1 (0x1), region = 104 }

</bundles_post_ra>
